<compile_context>
chip_gen: v6e
topology: v6e:2x2x1
jax: 0.10.0
libtpu: 0.0.40
codegen_flags: <defaults>
</compile_context>

<pallas_src>
import functools
import math

import jax
import jax.numpy as jnp
from jax import lax, random
from jax.experimental import pallas as pl
from jax.experimental.pallas import tpu as pltpu

_VMEM_LIMIT = 32 * 1024 * 1024


# ---------------------------------------------------------------------------
# Pallas kernels
# ---------------------------------------------------------------------------

def _mm_kernel(a_ref, b_ref, bias_ref, o_ref, acc_ref, *, act):
    """bf16 x bf16 tiled GEMM, f32 accumulate, fused +bias + activation."""
    @pl.when(pl.program_id(2) == 0)
    def _():
        acc_ref[...] = jnp.zeros_like(acc_ref)

    acc_ref[...] += jnp.dot(a_ref[...], b_ref[...],
                            preferred_element_type=jnp.float32)

    @pl.when(pl.program_id(2) == pl.num_programs(2) - 1)
    def _():
        y = acc_ref[...] + bias_ref[...]
        if act == "relu":
            y = jnp.maximum(y, 0.0)
        elif act == "leaky_relu":
            y = jnp.where(y > 0, y, 0.01 * y)   # nn.LeakyReLU default slope
        o_ref[...] = y.astype(o_ref.dtype)


def _mm_res_kernel(a_ref, b_ref, bias_ref, res_ref, o_ref, acc_ref, *, act):
    """Same as _mm_kernel but fuses a residual add before the activation."""
    @pl.when(pl.program_id(2) == 0)
    def _():
        acc_ref[...] = jnp.zeros_like(acc_ref)

    acc_ref[...] += jnp.dot(a_ref[...], b_ref[...],
                            preferred_element_type=jnp.float32)

    @pl.when(pl.program_id(2) == pl.num_programs(2) - 1)
    def _():
        y = acc_ref[...] + bias_ref[...] + res_ref[...].astype(jnp.float32)
        if act == "relu":
            y = jnp.maximum(y, 0.0)
        elif act == "leaky_relu":
            y = jnp.where(y > 0, y, 0.01 * y)
        o_ref[...] = y.astype(o_ref.dtype)


def _max3_kernel(a_ref, b_ref, c_ref, o_ref):
    o_ref[...] = jnp.maximum(jnp.maximum(a_ref[...], b_ref[...]), c_ref[...])


# ---------------------------------------------------------------------------
# Tile selection + cached pallas_call factories
# ---------------------------------------------------------------------------

def _round_up(x, m):
    return (x + m - 1) // m * m


def _best_divisor_tile(n, cap):
    """Largest multiple of 8 <= cap (and >= 128) that exactly divides n."""
    t = min(cap, n)
    t -= t % 8
    while t >= 128:
        if n % t == 0:
            return t
        t -= 8
    return None


def _choose_tiles(M, K, N):
    Np = _round_up(N, 128)

    # Reduction axis: single K step whenever it fits comfortably in VMEM.
    if K <= 2560:
        Kp = max(_round_up(K, 8), 128)       # 8-aligned, no 128-padding copy
        tk = Kp
    else:
        Kp = _round_up(K, 128)
        tk = None
        for cand in range(2560, 511, -128):
            if Kp % cand == 0:
                tk = cand
                break
        if tk is None:                       # no good divisor -> pad K
            tk = 2048
            Kp = _round_up(Kp, tk)

    # Rows: prefer an exact divisor of the 8-aligned row count (no wasted MACs).
    Mp8 = _round_up(M, 8)
    cap = 512 if Kp > 1024 else 1024         # keep the (tm, tk) tile bounded
    if Mp8 <= cap:
        tm, Mp = Mp8, Mp8
    else:
        tm = _best_divisor_tile(Mp8, cap)
        if tm is None:
            tm = cap if Mp8 >= 4 * cap else max(cap // 2, 128)
        Mp = _round_up(Mp8, tm)

    # Columns.
    tn = min(Np, 512)
    # Expose >=2 blocks on a parallel axis for megacore (v7x) when possible.
    if Mp // tm == 1 and Np // tn == 1 and Np % 256 == 0:
        tn = Np // 2
    return Mp, Kp, Np, tm, tk, tn


@functools.lru_cache(maxsize=None)
def _make_matmul(Mp, Kp, Np, tm, tk, tn, act, has_res, out_dtype):
    in_specs = [
        pl.BlockSpec((tm, tk), lambda i, j, k: (i, k)),
        pl.BlockSpec((tk, tn), lambda i, j, k: (k, j)),
        pl.BlockSpec((1, tn), lambda i, j, k: (0, j)),
    ]
    if has_res:
        in_specs.append(pl.BlockSpec((tm, tn), lambda i, j, k: (i, j)))
        kern = functools.partial(_mm_res_kernel, act=act)
    else:
        kern = functools.partial(_mm_kernel, act=act)
    fn = pl.pallas_call(
        kern,
        out_shape=jax.ShapeDtypeStruct((Mp, Np), out_dtype),
        grid_spec=pltpu.PrefetchScalarGridSpec(
            num_scalar_prefetch=0,
            grid=(Mp // tm, Np // tn, Kp // tk),
            in_specs=in_specs,
            out_specs=pl.BlockSpec((tm, tn), lambda i, j, k: (i, j)),
            scratch_shapes=[pltpu.VMEM((tm, tn), jnp.float32)],
        ),
        compiler_params=pltpu.CompilerParams(
            dimension_semantics=("parallel", "parallel", "arbitrary"),
            vmem_limit_bytes=_VMEM_LIMIT),
    )
    return jax.jit(fn)


def matmul_bias_act(a, b, bias, act="none", residual=None,
                    out_dtype=jnp.bfloat16):
    """out = act((bf16(a) @ bf16(b)) + bias [+ residual]); f32 accumulation."""
    M, K = a.shape
    K2, N = b.shape
    assert K == K2
    Mp, Kp, Np, tm, tk, tn = _choose_tiles(M, K, N)

    a_p = jnp.pad(a.astype(jnp.bfloat16), ((0, Mp - M), (0, Kp - K)))
    b_p = jnp.pad(b.astype(jnp.bfloat16), ((0, Kp - K), (0, Np - N)))
    bias_p = jnp.pad(bias.astype(jnp.float32).reshape(1, N),
                     ((0, 0), (0, Np - N)))

    if residual is not None:
        r_p = jnp.pad(residual.astype(jnp.bfloat16),
                      ((0, Mp - M), (0, Np - N)))
        out = _make_matmul(Mp, Kp, Np, tm, tk, tn, act, True, out_dtype)(
            a_p, b_p, bias_p, r_p)
    else:
        out = _make_matmul(Mp, Kp, Np, tm, tk, tn, act, False, out_dtype)(
            a_p, b_p, bias_p)
    return out[:M, :N]


@functools.lru_cache(maxsize=None)
def _make_max3(Rp, lanes, tr, dtype):
    fn = pl.pallas_call(
        _max3_kernel,
        out_shape=jax.ShapeDtypeStruct((Rp, lanes), dtype),
        grid_spec=pltpu.PrefetchScalarGridSpec(
            num_scalar_prefetch=0,
            grid=(Rp // tr,),
            in_specs=[pl.BlockSpec((tr, lanes), lambda i: (i, 0))
                      for _ in range(3)],
            out_specs=pl.BlockSpec((tr, lanes), lambda i: (i, 0)),
        ),
        compiler_params=pltpu.CompilerParams(
            dimension_semantics=("parallel",),
            vmem_limit_bytes=_VMEM_LIMIT),
    )
    return jax.jit(fn)


def _pallas_max3(a, b, c):
    """Elementwise max of three same-shape arrays, tiled & lane-dense."""
    shape = a.shape
    total = a.size
    lanes = 128 if total % 128 == 0 else shape[-1]
    R = total // lanes
    a2 = a.reshape(R, lanes)
    b2 = b.reshape(R, lanes)
    c2 = c.reshape(R, lanes)
    R8 = _round_up(R, 8)
    cap = max(8, min(1024, (1 << 18) // max(lanes, 1)))   # tile <= ~0.5 MB bf16
    tr = _best_divisor_tile(R8, cap) or min(R8, cap)
    Rp = _round_up(R8, tr)
    if Rp != R:
        pad = ((0, Rp - R), (0, 0))
        a2 = jnp.pad(a2, pad)
        b2 = jnp.pad(b2, pad)
        c2 = jnp.pad(c2, pad)
    out = _make_max3(Rp, lanes, tr, a.dtype)(a2, b2, c2)
    return out[:R].reshape(shape)


# ---------------------------------------------------------------------------
# Conv / pool / block helpers (im2col & slicing are JAX glue; GEMM in Pallas)
# ---------------------------------------------------------------------------

def conv_bn(x, w, scale, bias, stride, padding, act, residual=None):
    """x: (B,H,W,Cin) NHWC.  w: (Cout,Cin,KH,KW) (PyTorch layout).

    Folded inference BN: gamma is folded into the weight columns, so the GEMM
    epilogue is only +bias (+residual) (+activation).
    """
    B, H, W, Cin = x.shape
    Cout, _, KH, KW = w.shape
    Ho = (H + 2 * padding - KH) // stride + 1
    Wo = (W + 2 * padding - KW) // stride + 1

    x = x.astype(jnp.bfloat16)                       # bf16 im2col patches
    xp = jnp.pad(x, ((0, 0), (padding, padding), (padding, padding), (0, 0)))
    cols = []
    for kh in range(KH):
        for kw in range(KW):
            cols.append(lax.slice(
                xp, (0, kh, kw, 0),
                (B, kh + (Ho - 1) * stride + 1, kw + (Wo - 1) * stride + 1,
                 Cin),
                (1, stride, stride, 1)))
    patches = jnp.concatenate(cols, axis=-1).reshape(B * Ho * Wo,
                                                     KH * KW * Cin)
    wmat = jnp.transpose(w, (2, 3, 1, 0)).reshape(KH * KW * Cin, Cout)
    wmat = wmat * scale[None, :]                     # fold BN gamma
    res2d = None
    if residual is not None:
        res2d = residual.reshape(B * Ho * Wo, Cout)
    y = matmul_bias_act(patches, wmat, bias, act=act, residual=res2d,
                        out_dtype=jnp.bfloat16)
    return y.reshape(B, Ho, Wo, Cout)


def maxpool_3x3_s2_p1(x):
    """Separable 3x3/stride-2/pad-1 max pool; final reduction in Pallas."""
    B, H, W, C = x.shape
    Ho = (H + 2 - 3) // 2 + 1
    Wo = (W + 2 - 3) // 2 + 1
    neg = jnp.asarray(-1e30, x.dtype)
    xp = jnp.full((B, H + 2, W + 2, C), neg, x.dtype)
    xp = xp.at[:, 1:1 + H, 1:1 + W, :].set(x)
    # W-direction 3-tap max in-graph (XLA fuses the two maxima).
    wmax = None
    for kw in range(3):
        s = lax.slice(xp, (0, 0, kw, 0),
                      (B, H + 2, kw + (Wo - 1) * 2 + 1, C),
                      (1, 1, 2, 1))
        wmax = s if wmax is None else jnp.maximum(wmax, s)
    # H-direction 3 taps -> Pallas tiled elementwise max.
    taps = [lax.slice(wmax, (0, kh, 0, 0),
                      (B, kh + (Ho - 1) * 2 + 1, Wo, C),
                      (1, 2, 1, 1)) for kh in range(3)]
    return _pallas_max3(taps[0], taps[1], taps[2])


def basic_block(x, p, stride):
    out = conv_bn(x, p["conv1_w"], p["bn1_scale"], p["bn1_bias"],
                  stride, 1, "relu")
    if "down_w" in p:
        identity = conv_bn(x, p["down_w"], p["down_scale"], p["down_bias"],
                           stride, 0, "none")
    else:
        identity = x
    # conv2 + BN + residual add + ReLU fused into one GEMM epilogue.
    out = conv_bn(out, p["conv2_w"], p["bn2_scale"], p["bn2_bias"],
                  1, 1, "relu", residual=identity)
    return out


# ---------------------------------------------------------------------------
# Deterministic parameter init (synthetic; no checkpoint load)
# ---------------------------------------------------------------------------

RESNET34_CFG = ((64, 3, 1), (128, 4, 2), (256, 6, 2), (512, 3, 2))


def init_params(key, num_verbs, num_roles, vocab_size):
    keys = iter(random.split(key, 256))

    def nk():
        return next(keys)

    def conv_w(cout, cin, k):
        fan_in = cin * k * k
        return random.normal(nk(), (cout, cin, k, k), jnp.float32) * \
            math.sqrt(2.0 / fan_in)

    def bn(c):
        # Folded inference-mode BN (running_mean=0, running_var=1):
        # y = x * gamma + beta
        gamma = 0.5 + 0.05 * random.normal(nk(), (c,), jnp.float32)
        beta = 0.05 * random.normal(nk(), (c,), jnp.float32)
        return gamma, beta

    params = {}
    params["conv1_w"] = conv_w(64, 3, 7)
    params["bn1_scale"], params["bn1_bias"] = bn(64)

    layers = []
    in_c = 64
    for out_c, n_blocks, stride in RESNET34_CFG:
        blocks = []
        for b in range(n_blocks):
            s = stride if b == 0 else 1
            blk = {}
            blk["conv1_w"] = conv_w(out_c, in_c, 3)
            blk["bn1_scale"], blk["bn1_bias"] = bn(out_c)
            blk["conv2_w"] = conv_w(out_c, out_c, 3)
            blk["bn2_scale"], blk["bn2_bias"] = bn(out_c)
            if s != 1 or in_c != out_c:
                blk["down_w"] = conv_w(out_c, in_c, 1)
                blk["down_scale"], blk["down_bias"] = bn(out_c)
            blocks.append(blk)
            in_c = out_c
        layers.append(blocks)
    params["layers"] = layers

    # resnet_modified_small head: Linear(7*7*512, 1024)
    params["fc_w"] = random.normal(nk(), (7 * 7 * 512, 1024), jnp.float32) * \
        (1.0 / math.sqrt(7 * 7 * 512))
    params["fc_b"] = 0.01 * random.normal(nk(), (1024,), jnp.float32)
    # verb_module: Linear(1024, num_verbs)
    params["verb_w"] = random.normal(nk(), (1024, num_verbs), jnp.float32) * \
        (1.0 / math.sqrt(1024))
    params["verb_b"] = 0.01 * random.normal(nk(), (num_verbs,), jnp.float32)
    # role_module: num_roles x Linear(1024, vocab_size)
    params["role_w"] = random.normal(
        nk(), (num_roles, 1024, vocab_size), jnp.float32) * \
        (1.0 / math.sqrt(1024))
    params["role_b"] = 0.01 * random.normal(
        nk(), (num_roles, vocab_size), jnp.float32)
    return params


# ---------------------------------------------------------------------------
# baseline.forward
# ---------------------------------------------------------------------------

def baseline_forward(params, images_nchw, num_verbs, num_roles, vocab_size):
    x = jnp.transpose(images_nchw, (0, 2, 3, 1)).astype(jnp.float32)  # NHWC

    # --- resnet_modified_small (ResNet-34 backbone) ---
    x = conv_bn(x, params["conv1_w"], params["bn1_scale"], params["bn1_bias"],
                stride=2, padding=3, act="relu")
    x = maxpool_3x3_s2_p1(x)
    for li, (_, n_blocks, stride) in enumerate(RESNET34_CFG):
        for bi in range(n_blocks):
            s = stride if bi == 0 else 1
            x = basic_block(x, params["layers"][li][bi], s)

    # PyTorch flattens the NCHW tensor: (B, 512, 7, 7) -> (B, 7*7*512)
    B = x.shape[0]
    feat = jnp.transpose(x, (0, 3, 1, 2)).reshape(B, 7 * 7 * 512)

    # TODO(synk): Dropout2d / Dropout are train-mode stochastic ops; eval-mode
    # (identity) semantics are used here.
    img_emb = matmul_bias_act(feat, params["fc_w"], params["fc_b"],
                              act="leaky_relu", out_dtype=jnp.bfloat16)

    # verb head + role heads batched into ONE small GEMM, then split.
    role_w = jnp.transpose(params["role_w"], (1, 0, 2)).reshape(
        1024, num_roles * vocab_size)
    head_w = jnp.concatenate([params["verb_w"], role_w], axis=1)
    head_b = jnp.concatenate(
        [params["verb_b"], params["role_b"].reshape(-1)])
    head_out = matmul_bias_act(img_emb, head_w, head_b, act="none",
                               out_dtype=jnp.float32)
    verb_predict = head_out[:, :num_verbs]
    # == torch.stack(role_list).transpose(0, 1)
    role_predict = head_out[:, num_verbs:].reshape(B, num_roles, vocab_size)

    return verb_predict, role_predict


# ---------------------------------------------------------------------------
# main
# ---------------------------------------------------------------------------

if __name__ == "__main__":
    num_verbs, num_roles, vocab_size = 16, 4, 32
    B = 2

    key = random.PRNGKey(0)
    kp, kx, kv, kr = random.split(key, 4)
    params = init_params(kp, num_verbs, num_roles, vocab_size)

    # 224x224 input is required by the architecture (Linear expects 7*7*512).
    images = random.normal(kx, (B, 3, 224, 224), jnp.float32)       # NCHW
    verbs = random.randint(kv, (B,), 0, num_verbs)                  # unused in forward
    roles = random.randint(kr, (B, num_roles), 0, vocab_size)       # unused in forward

    verb_pred, role_pred = baseline_forward(
        params, images, num_verbs, num_roles, vocab_size)
    jax.block_until_ready((verb_pred, role_pred))

    assert verb_pred.shape == (B, num_verbs)
    assert role_pred.shape == (B, num_roles, vocab_size)
    assert bool(jnp.all(jnp.isfinite(verb_pred)))
    assert bool(jnp.all(jnp.isfinite(role_pred)))
    print("KERNEL_OK")
</pallas_src>

<mosaic_0001>
module attributes {stable_mosaic.version = 11 : i64} {
  func.func @_mm_kernel(%arg0: i32, %arg1: i32, %arg2: i32, %arg3: memref<896x152xbf16, #tpu.memory_space<vmem>>, %arg4: memref<152x128xbf16, #tpu.memory_space<vmem>>, %arg5: memref<1x128xf32, #tpu.memory_space<vmem>>, %arg6: memref<896x128xbf16, #tpu.memory_space<vmem>>, %arg7: memref<896x128xf32, #tpu.memory_space<vmem>>) attributes {dimension_semantics = [#tpu.dimension_semantics<parallel>, #tpu.dimension_semantics<parallel>, #tpu.dimension_semantics<arbitrary>], iteration_bounds = array<i64: 28, 1, 1>, scalar_prefetch = 0 : i64, scratch_operands = 1 : i64, tpu.core_type = #tpu.core_type<tc>, window_params = [{transform_indices = @transform_0, window_bounds = array<i64: 896, 152>}, {transform_indices = @transform_1, window_bounds = array<i64: 152, 128>}, {transform_indices = @transform_2, window_bounds = array<i64: 1, 128>}, {transform_indices = @transform_3, window_bounds = array<i64: 896, 128>}]} {
    %c0_i32 = arith.constant 0 : i32
    %0 = arith.cmpi eq, %arg2, %c0_i32 : i32
    %1 = arith.extui %0 : i1 to i32
    %c0_i32_0 = arith.constant 0 : i32
    %2 = arith.cmpi ne, %1, %c0_i32_0 : i32
    scf.if %2 {
      %cst_10 = arith.constant 0.000000e+00 : f32
      %12 = vector.broadcast %cst_10 : f32 to vector<896x128xf32>
      %c0_11 = arith.constant 0 : index
      %c0_12 = arith.constant 0 : index
      %13 = vector.load %arg7[%c0_11, %c0_12] : memref<896x128xf32, #tpu.memory_space<vmem>>, vector<896x128xf32>
      tpu.vector_store %arg7[%c0_11, %c0_12], %12 {strides = array<i32>} : memref<896x128xf32, #tpu.memory_space<vmem>>, vector<896x128xf32>,
    } else {
    }
    %c0 = arith.constant 0 : index
    %c0_1 = arith.constant 0 : index
    %3 = vector.load %arg7[%c0, %c0_1] : memref<896x128xf32, #tpu.memory_space<vmem>>, vector<896x128xf32>
    %c0_2 = arith.constant 0 : index
    %c0_3 = arith.constant 0 : index
    %4 = vector.load %arg3[%c0_2, %c0_3] : memref<896x152xbf16, #tpu.memory_space<vmem>>, vector<896x152xbf16>
    %c0_4 = arith.constant 0 : index
    %c0_5 = arith.constant 0 : index
    %5 = vector.load %arg4[%c0_4, %c0_5] : memref<152x128xbf16, #tpu.memory_space<vmem>>, vector<152x128xbf16>
    %cst = arith.constant dense<0.000000e+00> : vector<896x128xf32>
    %6 = tpu.matmul %4, %5, %cst {dimension_numbers = #tpu.dot_dimension_numbers<[1], [0], [0], [1], [0, 0, 1, 1], [], []>} : vector<896x152xbf16>, vector<152x128xbf16>, vector<896x128xf32> -> vector<896x128xf32>
    %7 = arith.addf %3, %6 : vector<896x128xf32>
    %c0_6 = arith.constant 0 : index
    %c0_7 = arith.constant 0 : index
    %8 = vector.load %arg7[%c0_6, %c0_7] : memref<896x128xf32, #tpu.memory_space<vmem>>, vector<896x128xf32>
    tpu.vector_store %arg7[%c0_6, %c0_7], %7 {strides = array<i32>} : memref<896x128xf32, #tpu.memory_space<vmem>>, vector<896x128xf32>,
    %c0_i32_8 = arith.constant 0 : i32
    %9 = arith.cmpi eq, %arg2, %c0_i32_8 : i32
    %10 = arith.extui %9 : i1 to i32
    %c0_i32_9 = arith.constant 0 : i32
    %11 = arith.cmpi ne, %10, %c0_i32_9 : i32
    scf.if %11 {
      %c0_10 = arith.constant 0 : index
      %c0_11 = arith.constant 0 : index
      %12 = vector.load %arg7[%c0_10, %c0_11] : memref<896x128xf32, #tpu.memory_space<vmem>>, vector<896x128xf32>
      %c0_12 = arith.constant 0 : index
      %c0_13 = arith.constant 0 : index
      %13 = vector.load %arg5[%c0_12, %c0_13] : memref<1x128xf32, #tpu.memory_space<vmem>>, vector<1x128xf32>
      %14 = vector.broadcast %13 : vector<1x128xf32> to vector<896x128xf32>
      %15 = arith.addf %12, %14 : vector<896x128xf32>
      %cst_14 = arith.constant 0.000000e+00 : f32
      %16 = vector.broadcast %cst_14 : f32 to vector<896x128xf32>
      %17 = arith.maximumf %15, %16 : vector<896x128xf32>
      %18 = arith.truncf %17 : vector<896x128xf32> to vector<896x128xbf16>
      %c0_15 = arith.constant 0 : index
      %c0_16 = arith.constant 0 : index
      %19 = vector.load %arg6[%c0_15, %c0_16] : memref<896x128xbf16, #tpu.memory_space<vmem>>, vector<896x128xbf16>
      tpu.vector_store %arg6[%c0_15, %c0_16], %18 {strides = array<i32>} : memref<896x128xbf16, #tpu.memory_space<vmem>>, vector<896x128xbf16>,
    } else {
    }
    return
  }
  func.func @transform_0(%arg0: i32, %arg1: i32, %arg2: i32) -> (i32, i32) {
    %c0_i32 = arith.constant 0 : i32
    return %arg0, %arg2 : i32, i32
  }
  func.func @transform_1(%arg0: i32, %arg1: i32, %arg2: i32) -> (i32, i32) {
    %c0_i32 = arith.constant 0 : i32
    return %arg2, %arg1 : i32, i32
  }
  func.func @transform_2(%arg0: i32, %arg1: i32, %arg2: i32) -> (i32, i32) {
    %c0_i32 = arith.constant 0 : i32
    %c0_i32_0 = arith.constant 0 : i32
    return %c0_i32, %arg1 : i32, i32
  }
  func.func @transform_3(%arg0: i32, %arg1: i32, %arg2: i32) -> (i32, i32) {
    %c0_i32 = arith.constant 0 : i32
    return %arg0, %arg1 : i32, i32
  }
}

</mosaic_0001>

<bundles_post_ra>
// kernel: tpu_custom_call.1
= control target key start
LH: loop header
LB: loop body
LE: loop exit
PB: predicated region body
PF: predicated region fallthrough
CT: control target
= control target key end

     0   :  { %8 = vsyncpa [#allocation4], 0  ;;  %s4700_s0 = inlined_call_operand.vmem [shape: bf16[25088,152], index: 0, kind: input, shape index: {}]   ;;  %s4701_s1 = inlined_call_operand.vmem [shape: bf16[152,128], index: 1, kind: input, shape index: {}]   ;;  %s4702_s2 = inlined_call_operand.vmem [shape: f32[1,128], index: 2, kind: input, shape index: {}]   ;;  %s4703_s3 = inlined_call_operand.hbm [shape: bf16[25088,128], index: 3, kind: output, shape index: {}]  }
   0x1   :  { %10 = vsyncpa [#allocation4 + $0x1], 0  ;;  %s4202_s12 = smov 0   ;;  %s4204_s13 = smov 0  }
   0x2   :  { %s4206_s14 = smov 0   ;;  %s4208_s15 = smov 0  }
   0x3   :  { %s4210_s16 = smov 0   ;;  %s4212_s17 = smov 0  }
   0x4 LB: > { %s3090_s18 = sadd.s32 4294967295, %s4176_s17   ;;  %s3091_s19 = sadd.s32 4294967294, %s4176_s17   ;;  %s4176_s17 = sphi %s4212_s17, %s16_s17   ;;  %s4172_s16 = sphi %s4210_s16, %s4710_s16   ;;  %s4168_s15 = sphi %s4208_s15, %s4709_s15   ;;  %s4164_s14 = sphi %s4206_s14, %s4708_s14   ;;  %s4160_s13 = sphi %s4204_s13, %s4707_s13   ;;  %s4156_s12 = sphi %s4202_s12, %s4706_s12  }
   0x5   : > { %s35_s20 = sadd.s32 1, %s4172_s16  ;;  %s126_s21 = sadd.s32 1, %s4164_s14 }
   0x6   : > { %p37_p0 = scmp.ge.s32.totalorder %s35_s20, 28  ;;  %p136_p1 = scmp.ne.s32.totalorder %s4164_s14, %s4160_s13 }
   0x7   : > { %p137_p2 = scmp.eq.s32.totalorder %s3090_s18, 27  ;;  %p142_p3 = scmp.ne.s32.totalorder %s4160_s13, %s4156_s12 }
   0x8   : > { %s4712_s20 = smov (%p37_p0, %s35_s20), 0  ;;  %p143_p5 = scmp.eq.s32.totalorder %s3091_s19, 27 }
   0x9   : > { %p4242_p4 = por %p137_p2, %p136_p1  ;;  %s121_s23 = ssub.s32 %s4172_s16, %s4712_s20 }
   0xa   : > { %p3096_p6 = scmp.ge.s32.totalorder %s4176_s17, 1  ;;  %p124_p7 = scmp.eq.s32.totalorder %s121_s23, 0 }
   0xb   : > { %p4249_p8 = por %p143_p5, %p142_p3  ;;  %p194_p9 = scmp.lt.s32.totalorder %s4176_s17, 29 }
   0xc   : > { %s4255_s25 = scalar_select %p124_p7, %s4164_s14, %s126_s21  }
   0xd   : > { %p195_p10 = pnand %p3096_p6, %p194_p9 }
   0xe   : > { %s234_s30 = smul.u32 (!%p195_p10), 112, %s4168_s15  ;;  %s231_s9 = sand.u32 (!%p195_p10), 1, %s4160_s13  }
   0xf   : > { %198 = sbr.rel (%p195_p10) target bundleno = 494 (0x1ee), region = 32 }
  0x10   : > { %p236_p11 = scmp.lt.s32.totalorder (!%p195_p10), %s234_s30, 3135  ;;  %s3862_s10 = smul.u32 (!%p195_p10), 448, %s231_s9 }
  0x11   : > { %s3506_s21 = smul.u32 (!%p195_p10), 7168, %s4168_s15  ;;  %s4655_s15 = scalar_lea.sflag (!%p195_p10), [#allocation4], %s231_s9 }
  0x12   : > { %s4465_s18 = scalar_lea.vmem (!%p195_p10), [#allocation3], %s3862_s10 }
  0x13   : > { %s2979_s23 = sshll.u32 (!%p195_p10), %s4465_s18, 4  ;;  %s4647_s28 = scalar_lea.hbm (!%p195_p10), %s4703_s3, %s3506_s21  ;;  %s4649_s23 = int_to_ptr.vmem [resolvable:$true] %s2979_s23 }
  0x14   : > { %v3921_v0 = vld [vmem:[%s4701_s1 + $0x38] sm:$0xff]   ;;  %v4178_v1 = vmov 0   ;;  %v3922_v2 = vld [vmem:[%s4701_s1 + $0x30] sm:$0xff]   ;;  %v3923_v3 = vld [vmem:[%s4701_s1 + $0x28] sm:$0xff]   ;;  %s4714_s30 = smov (!%p236_p11, %s234_s30), 3135  ;;  %vm1180_vm0 = vcmask 195584  }
  0x15   : > { %1353 = vmatprep.subr.bf16.mxu0 %v4178_v1  ;;  %3842 = vmatprep.subr.bf16.mxu1 %v4178_v1  ;;  %s3393_s6 = sshll.u32 %s4714_s30, 3  ;;  %v3924_v4 = vld [vmem:[%s4701_s1 + $0x20] sm:$0xff]   ;;  %v3925_v7 = vld [vmem:[%s4701_s1 + $0x18] sm:$0xff]   ;;  %v3926_v8 = vld [vmem:[%s4701_s1 + $0x10] sm:$0xff]   ;;  %vm1349_vm1 = vcmask 1043456   ;;  %s4100_s29 = scalar_lea.vmem %s4649_s23, 7168 }
  0x16   : > { %1354 = vmatpush1.bf16.msra.mxu0 %v3921_v0  ;;  %3852 = vmatpush1.bf16.msra.mxu1 %v3921_v0  ;;  %s4273_s11 = scalar_lea.vmem %s4700_s0, %s3393_s6  ;;  %v3927_v9 = vld [vmem:[%s4701_s1 + $0x8] sm:$0xff]   ;;  %v3928_v10 = vld [vmem:[%s4701_s1] sm:$0xff]   ;;  %p4101_p12 = scmp.ne.s32.totalorder %s4649_s23, %s4100_s29 }
  0x17   : > { %1355 = vmatprep.subr.bf16.mxu0 %v4178_v1  ;;  %3843 = vmatprep.subr.bf16.mxu1 %v4178_v1  ;;  %v3933_v5 = vld [vmem:[%s4273_s11 + $0x4] ss:$8 sps:$4 sm:$0xff]   ;;  %v3929_v11 = vld [vmem:[%s4701_s1 + $0x48] ss:$0 sps:$4 sm:$0xff]   ;;  %v3937_v16 = vld [vmem:[%s4273_s11 + $0x14] ss:$8 sps:$4 sm:$0xff]  }
  0x18   : > { %v3936_v6 = vld [vmem:[%s4273_s11 + $0x1c4] ss:$8 sps:$4 sm:$0xff]   ;;  %3221 = vmatprep.mubr.msk.bf16.mxu0 %vm1180_vm0, %v3933_v5  ;;  %v1351_v12 = vsel %vm1349_vm1, %v3929_v11, 0  ;;  %v3931_v14 = vld [vmem:[%s4273_s11] ss:$8 sps:$4 sm:$0xff]   ;;  %p4102_p13 = pnand %p4101_p12, %p4242_p4  ;;  %s4179_s30 = smov [#allocation3]  }
  0x19   : > { %3249 = vmatprep.mubr.msk.bf16.mxu1 %vm1180_vm0, %v3936_v6  ;;  %v3930_v13 = vld [vmem:[%s4701_s1 + $0x40] sm:$0xff]   ;;  %v3939_v17 = vld [vmem:[%s4273_s11 + $0x1d4] ss:$8 sps:$4 sm:$0xff]   ;;  %v3941_v18 = vld [vmem:[%s4273_s11 + $0x10] ss:$8 sps:$4 sm:$0xff]   ;;  %s4104_s4 = sshll.u32 %s4179_s30, 4  ;;  %s4105_s4 = int_to_ptr.vmem [resolvable:$false] %s4104_s4 }
  0x1a   : > { %1356 = vmatpush1.bf16.msra.mxu0 %v3922_v2  ;;  %3853 = vmatpush1.bf16.msra.mxu1 %v3922_v2  ;;  %v3934_v15 = vld [vmem:[%s4273_s11 + $0x1c0] ss:$8 sps:$4 sm:$0xff]   ;;  %v3942_v19 = vld [vmem:[%s4273_s11 + $0x1d0] ss:$8 sps:$4 sm:$0xff]   ;;  %v3943_v20 = vld [vmem:[%s4273_s11 + $0x24] ss:$8 sps:$4 sm:$0xff]   ;;  %p4103_p0 = pneg %p4102_p13  ;;  %p4107_p1 = scmp.lt.s32.totalorder %s4649_s23, %s4105_s4 }
  0x1b   : > { %1357 = vmatprep.subr.bf16.mxu0 %v4178_v1  ;;  %3844 = vmatprep.subr.bf16.mxu1 %v4178_v1  ;;  %v3945_v21 = vld [vmem:[%s4273_s11 + $0x1e4] ss:$8 sps:$4 sm:$0xff]   ;;  %v3947_v22 = vld [vmem:[%s4273_s11 + $0x20] ss:$8 sps:$4 sm:$0xff]   ;;  %v3949_v24 = vld [vmem:[%s4273_s11 + $0x34] ss:$8 sps:$4 sm:$0xff]  }
  0x1c   : > { %v3948_v23 = vld [vmem:[%s4273_s11 + $0x1e0] ss:$8 sps:$4 sm:$0xff]   ;;  %v3951_v25 = vld [vmem:[%s4273_s11 + $0x1f4] ss:$8 sps:$4 sm:$0xff]   ;;  %v3953_v26 = vld [vmem:[%s4273_s11 + $0x30] ss:$8 sps:$4 sm:$0xff]  }
  0x1d   : > { %v3954_v27 = vld [vmem:[%s4273_s11 + $0x1f0] ss:$8 sps:$4 sm:$0xff]   ;;  %v3955_v28 = vld [vmem:[%s4273_s11 + $0x44] ss:$8 sps:$4 sm:$0xff]   ;;  %v3959_v30 = vld [vmem:[%s4273_s11 + $0x40] ss:$8 sps:$4 sm:$0xff]  }
  0x1e   : > { %1358 = vmatpush1.bf16.msra.mxu0 %v3923_v3  ;;  %3854 = vmatpush1.bf16.msra.mxu1 %v3923_v3  ;;  %v3957_v29 = vld [vmem:[%s4273_s11 + $0x204] ss:$8 sps:$4 sm:$0xff]   ;;  %v3960_v31 = vld [vmem:[%s4273_s11 + $0x200] ss:$8 sps:$4 sm:$0xff]   ;;  %v3961_v32 = vld [vmem:[%s4273_s11 + $0x54] ss:$8 sps:$4 sm:$0xff]  }
  0x1f   : > { %1359 = vmatprep.subr.bf16.mxu0 %v4178_v1  ;;  %3845 = vmatprep.subr.bf16.mxu1 %v4178_v1  ;;  %v3963_v33 = vld [vmem:[%s4273_s11 + $0x214] ss:$8 sps:$4 sm:$0xff]   ;;  %v3965_v34 = vld [vmem:[%s4273_s11 + $0x50] ss:$8 sps:$4 sm:$0xff]   ;;  %v3967_v36 = vld [vmem:[%s4273_s11 + $0x64] ss:$8 sps:$4 sm:$0xff]  }
  0x20   : > { %v3966_v35 = vld [vmem:[%s4273_s11 + $0x210] ss:$8 sps:$4 sm:$0xff]   ;;  %v3969_v37 = vld [vmem:[%s4273_s11 + $0x224] ss:$8 sps:$4 sm:$0xff]   ;;  %v3971_v38 = vld [vmem:[%s4273_s11 + $0x60] ss:$8 sps:$4 sm:$0xff]  }
  0x21   : > { %v3972_v39 = vld [vmem:[%s4273_s11 + $0x220] ss:$8 sps:$4 sm:$0xff]   ;;  %v3973_v40 = vld [vmem:[%s4273_s11 + $0x74] ss:$8 sps:$4 sm:$0xff]   ;;  %v3977_v42 = vld [vmem:[%s4273_s11 + $0x70] ss:$8 sps:$4 sm:$0xff]  }
  0x22   : > { %1360 = vmatpush1.bf16.msra.mxu0 %v3924_v4  ;;  %3855 = vmatpush1.bf16.msra.mxu1 %v3924_v4  ;;  %v3975_v41 = vld [vmem:[%s4273_s11 + $0x234] ss:$8 sps:$4 sm:$0xff]   ;;  %v3978_v43 = vld [vmem:[%s4273_s11 + $0x230] ss:$8 sps:$4 sm:$0xff]   ;;  %v3979_v44 = vld [vmem:[%s4273_s11 + $0x84] ss:$8 sps:$4 sm:$0xff]  }
  0x23   : > { %1361 = vmatprep.subr.bf16.mxu0 %v4178_v1  ;;  %3846 = vmatprep.subr.bf16.mxu1 %v4178_v1  ;;  %v3981_v45 = vld [vmem:[%s4273_s11 + $0x244] ss:$8 sps:$4 sm:$0xff]   ;;  %v3983_v46 = vld [vmem:[%s4273_s11 + $0x80] ss:$8 sps:$4 sm:$0xff]   ;;  %v3985_v48 = vld [vmem:[%s4273_s11 + $0x94] ss:$8 sps:$4 sm:$0xff]  }
  0x24   : > { %v3984_v47 = vld [vmem:[%s4273_s11 + $0x240] ss:$8 sps:$4 sm:$0xff]   ;;  %v3987_v49 = vld [vmem:[%s4273_s11 + $0x254] ss:$8 sps:$4 sm:$0xff]   ;;  %v3989_v50 = vld [vmem:[%s4273_s11 + $0x90] ss:$8 sps:$4 sm:$0xff]  }
  0x25   : > { %v3990_v51 = vld [vmem:[%s4273_s11 + $0x250] ss:$8 sps:$4 sm:$0xff]   ;;  %v3991_v52 = vld [vmem:[%s4273_s11 + $0xa4] ss:$8 sps:$4 sm:$0xff]   ;;  %v3995_v54 = vld [vmem:[%s4273_s11 + $0xa0] ss:$8 sps:$4 sm:$0xff]  }
  0x26   : > { %1362 = vmatpush1.bf16.msra.mxu0 %v3925_v7  ;;  %3856 = vmatpush1.bf16.msra.mxu1 %v3925_v7  ;;  %v3993_v53 = vld [vmem:[%s4273_s11 + $0x264] ss:$8 sps:$4 sm:$0xff]   ;;  %v3996_v55 = vld [vmem:[%s4273_s11 + $0x260] ss:$8 sps:$4 sm:$0xff]   ;;  %v3997_v56 = vld [vmem:[%s4273_s11 + $0xb4] ss:$8 sps:$4 sm:$0xff]  }
  0x27   : > { %1363 = vmatprep.subr.bf16.mxu0 %v4178_v1  ;;  %3847 = vmatprep.subr.bf16.mxu1 %v4178_v1  ;;  %v3999_v57 = vld [vmem:[%s4273_s11 + $0x274] ss:$8 sps:$4 sm:$0xff]   ;;  %v4001_v58 = vld [vmem:[%s4273_s11 + $0xb0] ss:$8 sps:$4 sm:$0xff]   ;;  %v4003_v60 = vld [vmem:[%s4273_s11 + $0xc4] ss:$8 sps:$4 sm:$0xff]  }
  0x28   : > { %v4002_v59 = vld [vmem:[%s4273_s11 + $0x270] ss:$8 sps:$4 sm:$0xff]   ;;  %v4005_v61 = vld [vmem:[%s4273_s11 + $0x284] ss:$8 sps:$4 sm:$0xff]   ;;  %v4007_v62 = vld [vmem:[%s4273_s11 + $0xc0] ss:$8 sps:$4 sm:$0xff]  }
  0x29   : > { %v4008_v63 = vld [vmem:[%s4273_s11 + $0x280] ss:$8 sps:$4 sm:$0xff]   ;;  %v4009_v0 = vld [vmem:[%s4273_s11 + $0xd4] ss:$8 sps:$4 sm:$0xff]   ;;  %v4013_v2 = vld [vmem:[%s4273_s11 + $0xd0] ss:$8 sps:$4 sm:$0xff]  }
  0x2a   : > { %1364 = vmatpush1.bf16.msra.mxu0 %v3926_v8  ;;  %3857 = vmatpush1.bf16.msra.mxu1 %v3926_v8  ;;  %v4014_v3 = vld [vmem:[%s4273_s11 + $0x290] ss:$8 sps:$4 sm:$0xff]   ;;  %v4015_v4 = vld [vmem:[%s4273_s11 + $0xe4] ss:$8 sps:$4 sm:$0xff]   ;;  %v4019_v6 = vld [vmem:[%s4273_s11 + $0xe0] ss:$8 sps:$4 sm:$0xff]  }
  0x2b   : > { %1365 = vmatprep.subr.bf16.mxu0 %v4178_v1  ;;  %3848 = vmatprep.subr.bf16.mxu1 %v4178_v1  ;;  %v4017_v5 = vld [vmem:[%s4273_s11 + $0x2a4] ss:$8 sps:$4 sm:$0xff]   ;;  %v4020_v7 = vld [vmem:[%s4273_s11 + $0x2a0] ss:$8 sps:$4 sm:$0xff]   ;;  %v4021_v8 = vld [vmem:[%s4273_s11 + $0xf4] ss:$8 sps:$4 sm:$0xff]  }
  0x2c   : > { %v4026_v11 = vld [vmem:[%s4273_s11 + $0x2b0] ss:$8 sps:$4 sm:$0xff]   ;;  %s4106_s5 = scalar_lea.vmem %s4105_s4, 14336 }
  0x2d   : > { %p4108_p2 = scmp.lt.s32.totalorder %s4106_s5, %s4100_s29 }
  0x2e   : > { %1366 = vmatpush1.bf16.msra.mxu0 %v3927_v9  ;;  %3858 = vmatpush1.bf16.msra.mxu1 %v3927_v9  ;;  %v4023_v9 = vld [vmem:[%s4273_s11 + $0x2b4] ss:$8 sps:$4 sm:$0xff]  }
  0x2f   : > { %1367 = vmatprep.subr.bf16.mxu0 %v4178_v1  ;;  %3849 = vmatprep.subr.bf16.mxu1 %v4178_v1  ;;  %p4109_p3 = por %p4108_p2, %p4107_p1 }
  0x31   : > { %p4110_p5 = pnand %p4109_p3, %p4103_p0 }
  0x32   : > { %1368 = vmatpush1.bf16.msra.mxu0 %v3928_v10  ;;  %3859 = vmatpush1.bf16.msra.mxu1 %v3928_v10  ;;  %v4025_v10 = vld [vmem:[%s4273_s11 + $0xf0] ss:$8 sps:$4 sm:$0xff]  }
  0x33   : > { %1381 = vmatprep.subr.bf16.mxu0 %v4178_v1  ;;  %3850 = vmatprep.subr.bf16.mxu1 %v4178_v1 }
  0x36   : > { %1382 = vmatpush2.bf16.msra.mxu0 %v1351_v12  ;;  %3860 = vmatpush2.bf16.msra.mxu1 %v1351_v12  ;;  %v4027_v12 = vld [vmem:[%s4273_s11 + $0x104] ss:$8 sps:$4 sm:$0xff]  }
  0x37   : > { %1383 = vmatprep.subr.bf16.mxu0 %v4178_v1  ;;  %3851 = vmatprep.subr.bf16.mxu1 %v4178_v1  ;;  %v4011_v1 = vld [vmem:[%s4273_s11 + $0x294] ss:$8 sps:$4 sm:$0xff]  }
  0x3a   : > { %1384 = vmatpush2.bf16.msra.mxu0 %v3930_v13  ;;  %3861 = vmatpush2.bf16.msra.mxu1 %v3930_v13  ;;  %v4029_v13 = vld [vmem:[%s4273_s11 + $0x2c4] ss:$8 sps:$4 sm:$0xff]  }
  0x3d   : > { %1386 = vmatmul.mubr.bf16.vlgmr.msra.gmra.mxu0 %v3931_v14  ;;  %1610 = vmatmul.mubr.bf16.vlgmr.msra.gmra.mxu1 %v3934_v15  ;;  %v4031_v14 = vld [vmem:[%s4273_s11 + $0x100] ss:$8 sps:$4 sm:$0xff]  }
  0x3e   : > { %3222 = vmatprep.mubr.msk.bf16.mxu0 %vm1180_vm0, %v3937_v16  ;;  %3250 = vmatprep.mubr.msk.bf16.mxu1 %vm1180_vm0, %v3939_v17  ;;  %v4032_v15 = vld [vmem:[%s4273_s11 + $0x2c0] ss:$8 sps:$4 sm:$0xff]   ;;  %v4033_v16 = vld [vmem:[%s4273_s11 + $0x114] ss:$8 sps:$4 sm:$0xff]  }
  0x3f   : > { %v4035_v17 = vld [vmem:[%s4273_s11 + $0x2d4] ss:$8 sps:$4 sm:$0xff]  }
  0x45   : > { %1394 = vmatmul.mubr.bf16.gmra.mxu0 %v3941_v18  ;;  %1618 = vmatmul.mubr.bf16.gmra.mxu1 %v3942_v19  ;;  %v4037_v18 = vld [vmem:[%s4273_s11 + $0x110] ss:$8 sps:$4 sm:$0xff]  }
  0x46   : > { %3223 = vmatprep.mubr.msk.bf16.mxu0 %vm1180_vm0, %v3943_v20  ;;  %3251 = vmatprep.mubr.msk.bf16.mxu1 %vm1180_vm0, %v3945_v21  ;;  %v4038_v19 = vld [vmem:[%s4273_s11 + $0x2d0] ss:$8 sps:$4 sm:$0xff]   ;;  %v4039_v20 = vld [vmem:[%s4273_s11 + $0x124] ss:$8 sps:$4 sm:$0xff]  }
  0x47   : > { %v4041_v21 = vld [vmem:[%s4273_s11 + $0x2e4] ss:$8 sps:$4 sm:$0xff]  }
  0x4d   : > { %1402 = vmatmul.mubr.bf16.gmra.mxu0 %v3947_v22  ;;  %1626 = vmatmul.mubr.bf16.gmra.mxu1 %v3948_v23  ;;  %v4043_v22 = vld [vmem:[%s4273_s11 + $0x120] ss:$8 sps:$4 sm:$0xff]  }
  0x4e   : > { %3224 = vmatprep.mubr.msk.bf16.mxu0 %vm1180_vm0, %v3949_v24  ;;  %3252 = vmatprep.mubr.msk.bf16.mxu1 %vm1180_vm0, %v3951_v25  ;;  %v4044_v23 = vld [vmem:[%s4273_s11 + $0x2e0] ss:$8 sps:$4 sm:$0xff]   ;;  %v4045_v24 = vld [vmem:[%s4273_s11 + $0x134] ss:$8 sps:$4 sm:$0xff]  }
  0x4f   : > { %v4047_v25 = vld [vmem:[%s4273_s11 + $0x2f4] ss:$8 sps:$4 sm:$0xff]  }
  0x55   : > { %1410 = vmatmul.mubr.bf16.gmra.mxu0 %v3953_v26  ;;  %1634 = vmatmul.mubr.bf16.gmra.mxu1 %v3954_v27  ;;  %v4049_v26 = vld [vmem:[%s4273_s11 + $0x130] ss:$8 sps:$4 sm:$0xff]  }
  0x56   : > { %3225 = vmatprep.mubr.msk.bf16.mxu0 %vm1180_vm0, %v3955_v28  ;;  %3253 = vmatprep.mubr.msk.bf16.mxu1 %vm1180_vm0, %v3957_v29  ;;  %v4050_v27 = vld [vmem:[%s4273_s11 + $0x2f0] ss:$8 sps:$4 sm:$0xff]   ;;  %v4051_v28 = vld [vmem:[%s4273_s11 + $0x144] ss:$8 sps:$4 sm:$0xff]  }
  0x57   : > { %v4053_v29 = vld [vmem:[%s4273_s11 + $0x304] ss:$8 sps:$4 sm:$0xff]  }
  0x5d   : > { %1418 = vmatmul.mubr.bf16.gmra.mxu0 %v3959_v30  ;;  %1642 = vmatmul.mubr.bf16.gmra.mxu1 %v3960_v31  ;;  %v4055_v30 = vld [vmem:[%s4273_s11 + $0x140] ss:$8 sps:$4 sm:$0xff]  }
  0x5e   : > { %3226 = vmatprep.mubr.msk.bf16.mxu0 %vm1180_vm0, %v3961_v32  ;;  %3254 = vmatprep.mubr.msk.bf16.mxu1 %vm1180_vm0, %v3963_v33  ;;  %v4056_v31 = vld [vmem:[%s4273_s11 + $0x300] ss:$8 sps:$4 sm:$0xff]   ;;  %v4057_v32 = vld [vmem:[%s4273_s11 + $0x154] ss:$8 sps:$4 sm:$0xff]  }
  0x5f   : > { %v4059_v33 = vld [vmem:[%s4273_s11 + $0x314] ss:$8 sps:$4 sm:$0xff]  }
  0x65   : > { %1426 = vmatmul.mubr.bf16.gmra.mxu0 %v3965_v34  ;;  %1650 = vmatmul.mubr.bf16.gmra.mxu1 %v3966_v35  ;;  %v4061_v34 = vld [vmem:[%s4273_s11 + $0x150] ss:$8 sps:$4 sm:$0xff]  }
  0x66   : > { %3227 = vmatprep.mubr.msk.bf16.mxu0 %vm1180_vm0, %v3967_v36  ;;  %3255 = vmatprep.mubr.msk.bf16.mxu1 %vm1180_vm0, %v3969_v37  ;;  %v4062_v35 = vld [vmem:[%s4273_s11 + $0x310] ss:$8 sps:$4 sm:$0xff]   ;;  %v4063_v36 = vld [vmem:[%s4273_s11 + $0x164] ss:$8 sps:$4 sm:$0xff]  }
  0x67   : > { %v4065_v37 = vld [vmem:[%s4273_s11 + $0x324] ss:$8 sps:$4 sm:$0xff]  }
  0x6d   : > { %1434 = vmatmul.mubr.bf16.gmra.mxu0 %v3971_v38  ;;  %1658 = vmatmul.mubr.bf16.gmra.mxu1 %v3972_v39  ;;  %v4067_v38 = vld [vmem:[%s4273_s11 + $0x160] ss:$8 sps:$4 sm:$0xff]  }
  0x6e   : > { %3228 = vmatprep.mubr.msk.bf16.mxu0 %vm1180_vm0, %v3973_v40  ;;  %3256 = vmatprep.mubr.msk.bf16.mxu1 %vm1180_vm0, %v3975_v41  ;;  %v4068_v39 = vld [vmem:[%s4273_s11 + $0x320] ss:$8 sps:$4 sm:$0xff]   ;;  %v4069_v40 = vld [vmem:[%s4273_s11 + $0x174] ss:$8 sps:$4 sm:$0xff]  }
  0x6f   : > { %v4071_v41 = vld [vmem:[%s4273_s11 + $0x334] ss:$8 sps:$4 sm:$0xff]  }
  0x75   : > { %1442 = vmatmul.mubr.bf16.gmra.mxu0 %v3977_v42  ;;  %1666 = vmatmul.mubr.bf16.gmra.mxu1 %v3978_v43  ;;  %v4073_v42 = vld [vmem:[%s4273_s11 + $0x170] ss:$8 sps:$4 sm:$0xff]  }
  0x76   : > { %3229 = vmatprep.mubr.msk.bf16.mxu0 %vm1180_vm0, %v3979_v44  ;;  %3257 = vmatprep.mubr.msk.bf16.mxu1 %vm1180_vm0, %v3981_v45  ;;  %v4074_v43 = vld [vmem:[%s4273_s11 + $0x330] ss:$8 sps:$4 sm:$0xff]   ;;  %v4075_v44 = vld [vmem:[%s4273_s11 + $0x184] ss:$8 sps:$4 sm:$0xff]  }
  0x77   : > { %v4077_v45 = vld [vmem:[%s4273_s11 + $0x344] ss:$8 sps:$4 sm:$0xff]  }
  0x7d   : > { %1450 = vmatmul.mubr.bf16.gmra.mxu0 %v3983_v46  ;;  %1674 = vmatmul.mubr.bf16.gmra.mxu1 %v3984_v47  ;;  %v4079_v46 = vld [vmem:[%s4273_s11 + $0x180] ss:$8 sps:$4 sm:$0xff]  }
  0x7e   : > { %3230 = vmatprep.mubr.msk.bf16.mxu0 %vm1180_vm0, %v3985_v48  ;;  %3258 = vmatprep.mubr.msk.bf16.mxu1 %vm1180_vm0, %v3987_v49  ;;  %v4080_v47 = vld [vmem:[%s4273_s11 + $0x340] ss:$8 sps:$4 sm:$0xff]   ;;  %v4081_v48 = vld [vmem:[%s4273_s11 + $0x194] ss:$8 sps:$4 sm:$0xff]  }
  0x7f   : > { %v4083_v49 = vld [vmem:[%s4273_s11 + $0x354] ss:$8 sps:$4 sm:$0xff]  }
  0x85   : > { %1458 = vmatmul.mubr.bf16.gmra.mxu0 %v3989_v50  ;;  %1682 = vmatmul.mubr.bf16.gmra.mxu1 %v3990_v51  ;;  %v4448_v51 = vld [vmem:[%s4702_s2] ss:$0 sm:$0xff] }
  0x86   : > { %3231 = vmatprep.mubr.msk.bf16.mxu0 %vm1180_vm0, %v3991_v52  ;;  %3259 = vmatprep.mubr.msk.bf16.mxu1 %vm1180_vm0, %v3993_v53 }
  0x8d   : > { %1466 = vmatmul.mubr.bf16.gmra.mxu0 %v3995_v54  ;;  %1690 = vmatmul.mubr.bf16.gmra.mxu1 %v3996_v55 }
  0x8e   : > { %3232 = vmatprep.mubr.msk.bf16.mxu0 %vm1180_vm0, %v3997_v56  ;;  %3260 = vmatprep.mubr.msk.bf16.mxu1 %vm1180_vm0, %v3999_v57 }
  0x95   : > { %1474 = vmatmul.mubr.bf16.gmra.mxu0 %v4001_v58  ;;  %1698 = vmatmul.mubr.bf16.gmra.mxu1 %v4002_v59  ;;  %v4085_v59 = vld [vmem:[%s4273_s11 + $0x190] ss:$8 sps:$4 sm:$0xff]  }
  0x96   : > { %3233 = vmatprep.mubr.msk.bf16.mxu0 %vm1180_vm0, %v4003_v60  ;;  %3261 = vmatprep.mubr.msk.bf16.mxu1 %vm1180_vm0, %v4005_v61  ;;  %v4086_v60 = vld [vmem:[%s4273_s11 + $0x350] ss:$8 sps:$4 sm:$0xff]  }
  0x9d   : > { %1482 = vmatmul.mubr.bf16.gmra.mxu0 %v4007_v62  ;;  %1706 = vmatmul.mubr.bf16.gmra.mxu1 %v4008_v63  ;;  %v4087_v63 = vld [vmem:[%s4273_s11 + $0x1a4] ss:$8 sps:$4 sm:$0xff]  }
  0x9e   : > { %3234 = vmatprep.mubr.msk.bf16.mxu0 %vm1180_vm0, %v4009_v0  ;;  %3262 = vmatprep.mubr.msk.bf16.mxu1 %vm1180_vm0, %v4011_v1 }
  0xa5   : > { %1490 = vmatmul.mubr.bf16.gmra.mxu0 %v4013_v2  ;;  %1714 = vmatmul.mubr.bf16.gmra.mxu1 %v4014_v3  ;;  %v4089_v2 = vld [vmem:[%s4273_s11 + $0x364] ss:$8 sps:$4 sm:$0xff]  }
  0xa6   : > { %3235 = vmatprep.mubr.msk.bf16.mxu0 %vm1180_vm0, %v4015_v4  ;;  %3263 = vmatprep.mubr.msk.bf16.mxu1 %vm1180_vm0, %v4017_v5 }
  0xad   : > { %1498 = vmatmul.mubr.bf16.gmra.mxu0 %v4019_v6  ;;  %1722 = vmatmul.mubr.bf16.gmra.mxu1 %v4020_v7 }
  0xae   : > { %3236 = vmatprep.mubr.msk.bf16.mxu0 %vm1180_vm0, %v4021_v8  ;;  %3264 = vmatprep.mubr.msk.bf16.mxu1 %vm1180_vm0, %v4023_v9 }
  0xb5   : > { %1506 = vmatmul.mubr.bf16.gmra.mxu0 %v4025_v10  ;;  %1730 = vmatmul.mubr.bf16.gmra.mxu1 %v4026_v11 }
  0xb6   : > { %3237 = vmatprep.mubr.msk.bf16.mxu0 %vm1180_vm0, %v4027_v12  ;;  %3265 = vmatprep.mubr.msk.bf16.mxu1 %vm1180_vm0, %v4029_v13 }
  0xbd   : > { %1514 = vmatmul.mubr.bf16.gmra.mxu0 %v4031_v14  ;;  %1738 = vmatmul.mubr.bf16.gmra.mxu1 %v4032_v15 }
  0xbe   : > { %3238 = vmatprep.mubr.msk.bf16.mxu0 %vm1180_vm0, %v4033_v16  ;;  %3266 = vmatprep.mubr.msk.bf16.mxu1 %vm1180_vm0, %v4035_v17  ;;  %v4091_v17 = vld [vmem:[%s4273_s11 + $0x1a0] ss:$8 sps:$4 sm:$0xff]  }
  0xc5   : > { %1522 = vmatmul.mubr.bf16.gmra.mxu0 %v4037_v18  ;;  %1746 = vmatmul.mubr.bf16.gmra.mxu1 %v4038_v19  ;;  %v4092_v18 = vld [vmem:[%s4273_s11 + $0x360] ss:$8 sps:$4 sm:$0xff]  }
  0xc6   : > { %3239 = vmatprep.mubr.msk.bf16.mxu0 %vm1180_vm0, %v4039_v20  ;;  %3267 = vmatprep.mubr.msk.bf16.mxu1 %vm1180_vm0, %v4041_v21  ;;  %v4093_v21 = vld [vmem:[%s4273_s11 + $0x1b4] ss:$8 sps:$4 sm:$0xff]  }
  0xcd   : > { %1530 = vmatmul.mubr.bf16.gmra.mxu0 %v4043_v22  ;;  %1754 = vmatmul.mubr.bf16.gmra.mxu1 %v4044_v23 }
  0xce   : > { %3240 = vmatprep.mubr.msk.bf16.mxu0 %vm1180_vm0, %v4045_v24  ;;  %3268 = vmatprep.mubr.msk.bf16.mxu1 %vm1180_vm0, %v4047_v25  ;;  %v4095_v24 = vld [vmem:[%s4273_s11 + $0x374] ss:$8 sps:$4 sm:$0xff]  }
  0xd5   : > { %1538 = vmatmul.mubr.bf16.gmra.mxu0 %v4049_v26  ;;  %1762 = vmatmul.mubr.bf16.gmra.mxu1 %v4050_v27 }
  0xd6   : > { %3241 = vmatprep.mubr.msk.bf16.mxu0 %vm1180_vm0, %v4051_v28  ;;  %3269 = vmatprep.mubr.msk.bf16.mxu1 %vm1180_vm0, %v4053_v29 }
  0xdd   : > { %1546 = vmatmul.mubr.bf16.gmra.mxu0 %v4055_v30  ;;  %1770 = vmatmul.mubr.bf16.gmra.mxu1 %v4056_v31 }
  0xde   : > { %3242 = vmatprep.mubr.msk.bf16.mxu0 %vm1180_vm0, %v4057_v32  ;;  %3270 = vmatprep.mubr.msk.bf16.mxu1 %vm1180_vm0, %v4059_v33 }
  0xe5   : > { %1554 = vmatmul.mubr.bf16.gmra.mxu0 %v4061_v34  ;;  %1778 = vmatmul.mubr.bf16.gmra.mxu1 %v4062_v35 }
  0xe6   : > { %3243 = vmatprep.mubr.msk.bf16.mxu0 %vm1180_vm0, %v4063_v36  ;;  %3271 = vmatprep.mubr.msk.bf16.mxu1 %vm1180_vm0, %v4065_v37 }
  0xed   : > { %1562 = vmatmul.mubr.bf16.gmra.mxu0 %v4067_v38  ;;  %1786 = vmatmul.mubr.bf16.gmra.mxu1 %v4068_v39  ;;  %v4097_v39 = vld [vmem:[%s4273_s11 + $0x1b0] ss:$8 sps:$4 sm:$0xff]  }
  0xee   : > { %3244 = vmatprep.mubr.msk.bf16.mxu0 %vm1180_vm0, %v4069_v40  ;;  %3272 = vmatprep.mubr.msk.bf16.mxu1 %vm1180_vm0, %v4071_v41  ;;  %v4098_v40 = vld [vmem:[%s4273_s11 + $0x370] ss:$8 sps:$4 sm:$0xff]  }
  0xf5   : > { %1570 = vmatmul.mubr.bf16.gmra.mxu0 %v4073_v42  ;;  %1794 = vmatmul.mubr.bf16.gmra.mxu1 %v4074_v43 }
  0xf6   : > { %3245 = vmatprep.mubr.msk.bf16.mxu0 %vm1180_vm0, %v4075_v44  ;;  %3273 = vmatprep.mubr.msk.bf16.mxu1 %vm1180_vm0, %v4077_v45 }
  0xfd   : > { %v1387_v50 = vpop.f32.mrf.mxu0  ;;  %1578 = vmatmul.mubr.bf16.gmra.mxu0 %v4079_v46  ;;  %v1611_v52 = vpop.f32.mrf.mxu1  ;;  %1802 = vmatmul.mubr.bf16.gmra.mxu1 %v4080_v47 }
  0xfe   : > { %3246 = vmatprep.mubr.msk.bf16.mxu0 %vm1180_vm0, %v4081_v48  ;;  %3274 = vmatprep.mubr.msk.bf16.mxu1 %vm1180_vm0, %v4083_v49  ;;  %v2180_v55 = vadd.f32 %v4448_v51, %v1387_v50  ;;  %v2236_v56 = vadd.f32 %v4448_v51, %v1611_v52 }
  0xff   : > { %v1389_v53 = vpop.f32.mrf.mxu0  ;;  %v1613_v54 = vpop.f32.mrf.mxu1 }
 0x100   : > { %v2292_v3 = vmax.f32 %v2180_v55, 0.0  ;;  %v2348_v4 = vmax.f32 %v2236_v56, 0.0 }
 0x101   : > { %v1390_v57 = vpop.f32.mrf.mxu0  ;;  %v1614_v58 = vpop.f32.mrf.mxu1 }
 0x102   : > { %v2181_v61 = vadd.f32 %v4448_v51, %v1390_v57  ;;  %v2237_v62 = vadd.f32 %v4448_v51, %v1614_v58 }
 0x103   : > { %v1392_v0 = vpop.f32.mrf.mxu0  ;;  %v1616_v1 = vpop.f32.mrf.mxu1 }
 0x104   : > { %v2293_v5 = vmax.f32 %v2181_v61, 0.0  ;;  %v2349_v6 = vmax.f32 %v2237_v62, 0.0 }
 0x105   : > { %v1395_v7 = vpop.f32.mrf.mxu0  ;;  %1586 = vmatmul.mubr.bf16.gmra.mxu0 %v4085_v59  ;;  %v1619_v8 = vpop.f32.mrf.mxu1  ;;  %1810 = vmatmul.mubr.bf16.gmra.mxu1 %v4086_v60 }
 0x106   : > { %v3510_v9 = vpack.c.bf16 %v2293_v5, %v2292_v3  ;;  %v3650_v10 = vpack.c.bf16 %v2349_v6, %v2348_v4  ;;  %3247 = vmatprep.mubr.msk.bf16.mxu0 %vm1180_vm0, %v4087_v63  ;;  %3275 = vmatprep.mubr.msk.bf16.mxu1 %vm1180_vm0, %v4089_v2  ;;  %v2182_v13 = vadd.f32 %v4448_v51, %v1395_v7 }
 0x107   : > { %v1397_v11 = vpop.f32.mrf.mxu0  ;;  %v1621_v12 = vpop.f32.mrf.mxu1  ;;  %v2238_v14 = vadd.f32 %v4448_v51, %v1619_v8 }
 0x108   : > { %3511 = vst [vmem:[%s4465_s18] sm:$0xff] %v3510_v9   ;;  %3814 = vst [vmem:[%s4465_s18 + $0xe0] sm:$0xff] %v3650_v10   ;;  %v2294_v25 = vmax.f32 %v2182_v13, 0.0 }
 0x109   : > { %v1398_v15 = vpop.f32.mrf.mxu0  ;;  %v1622_v16 = vpop.f32.mrf.mxu1  ;;  %v2350_v26 = vmax.f32 %v2238_v14, 0.0 }
 0x10a   : > { %v2183_v19 = vadd.f32 %v4448_v51, %v1398_v15  ;;  %v2239_v20 = vadd.f32 %v4448_v51, %v1622_v16 }
 0x10b   : > { %v1400_v22 = vpop.f32.mrf.mxu0  ;;  %v1624_v23 = vpop.f32.mrf.mxu1 }
 0x10c   : > { %v2295_v27 = vmax.f32 %v2183_v19, 0.0  ;;  %v2351_v28 = vmax.f32 %v2239_v20, 0.0 }
 0x10d   : > { %v1403_v29 = vpop.f32.mrf.mxu0  ;;  %1594 = vmatmul.mubr.bf16.gmra.mxu0 %v4091_v17  ;;  %v1627_v30 = vpop.f32.mrf.mxu1  ;;  %1818 = vmatmul.mubr.bf16.gmra.mxu1 %v4092_v18 }
 0x10e   : > { %v3515_v31 = vpack.c.bf16 %v2295_v27, %v2294_v25  ;;  %v3655_v32 = vpack.c.bf16 %v2351_v28, %v2350_v26  ;;  %3248 = vmatprep.mubr.msk.bf16.mxu0 %vm1180_vm0, %v4093_v21  ;;  %3276 = vmatprep.mubr.msk.bf16.mxu1 %vm1180_vm0, %v4095_v24  ;;  %v2184_v35 = vadd.f32 %v4448_v51, %v1403_v29 }
 0x10f   : > { %v1405_v33 = vpop.f32.mrf.mxu0  ;;  %v1629_v34 = vpop.f32.mrf.mxu1  ;;  %v2240_v36 = vadd.f32 %v4448_v51, %v1627_v30 }
 0x110   : > { %3787 = vst [vmem:[%s4465_s18 + $0x8] sm:$0xff] %v3515_v31   ;;  %3815 = vst [vmem:[%s4465_s18 + $0xe8] sm:$0xff] %v3655_v32   ;;  %v2296_v45 = vmax.f32 %v2184_v35, 0.0 }
 0x111   : > { %v1406_v37 = vpop.f32.mrf.mxu0  ;;  %v1630_v38 = vpop.f32.mrf.mxu1  ;;  %v2352_v46 = vmax.f32 %v2240_v36, 0.0 }
 0x112   : > { %v2185_v41 = vadd.f32 %v4448_v51, %v1406_v37  ;;  %v2241_v42 = vadd.f32 %v4448_v51, %v1630_v38 }
 0x113   : > { %v1408_v43 = vpop.f32.mrf.mxu0  ;;  %v1632_v44 = vpop.f32.mrf.mxu1 }
 0x114   : > { %v2297_v47 = vmax.f32 %v2185_v41, 0.0  ;;  %v2353_v48 = vmax.f32 %v2241_v42, 0.0 }
 0x115   : > { %v1411_v49 = vpop.f32.mrf.mxu0  ;;  %1602 = vmatmul.mubr.bf16.gmra.mxu0 %v4097_v39  ;;  %v1635_v50 = vpop.f32.mrf.mxu1  ;;  %1826 = vmatmul.mubr.bf16.gmra.mxu1 %v4098_v40 }
 0x116   : > { %v3520_v52 = vpack.c.bf16 %v2297_v47, %v2296_v45  ;;  %v3660_v53 = vpack.c.bf16 %v2353_v48, %v2352_v46  ;;  %v2186_v56 = vadd.f32 %v4448_v51, %v1411_v49  ;;  %v2242_v57 = vadd.f32 %v4448_v51, %v1635_v50 }
 0x117   : > { %v1413_v54 = vpop.f32.mrf.mxu0  ;;  %v1637_v55 = vpop.f32.mrf.mxu1 }
 0x118   : > { %3788 = vst [vmem:[%s4465_s18 + $0x10] sm:$0xff] %v3520_v52   ;;  %3816 = vst [vmem:[%s4465_s18 + $0xf0] sm:$0xff] %v3660_v53   ;;  %v2298_v0 = vmax.f32 %v2186_v56, 0.0  ;;  %v2354_v1 = vmax.f32 %v2242_v57, 0.0 }
 0x119   : > { %v1414_v58 = vpop.f32.mrf.mxu0  ;;  %v1638_v59 = vpop.f32.mrf.mxu1 }
 0x11a   : > { %v2187_v60 = vadd.f32 %v4448_v51, %v1414_v58  ;;  %v2243_v61 = vadd.f32 %v4448_v51, %v1638_v59 }
 0x11b   : > { %v1416_v62 = vpop.f32.mrf.mxu0  ;;  %v1640_v63 = vpop.f32.mrf.mxu1 }
 0x11c   : > { %v2299_v2 = vmax.f32 %v2187_v60, 0.0  ;;  %v2355_v3 = vmax.f32 %v2243_v61, 0.0 }
 0x11d   : > { %v1419_v4 = vpop.f32.mrf.mxu0  ;;  %v1643_v5 = vpop.f32.mrf.mxu1 }
 0x11e   : > { %v3525_v6 = vpack.c.bf16 %v2299_v2, %v2298_v0  ;;  %v3665_v7 = vpack.c.bf16 %v2355_v3, %v2354_v1  ;;  %v2188_v10 = vadd.f32 %v4448_v51, %v1419_v4  ;;  %v2244_v11 = vadd.f32 %v4448_v51, %v1643_v5 }
 0x11f   : > { %v1421_v8 = vpop.f32.mrf.mxu0  ;;  %v1645_v9 = vpop.f32.mrf.mxu1 }
 0x120   : > { %3789 = vst [vmem:[%s4465_s18 + $0x18] sm:$0xff] %v3525_v6   ;;  %3817 = vst [vmem:[%s4465_s18 + $0xf8] sm:$0xff] %v3665_v7   ;;  %v2300_v18 = vmax.f32 %v2188_v10, 0.0  ;;  %v2356_v19 = vmax.f32 %v2244_v11, 0.0 }
 0x121   : > { %v1422_v12 = vpop.f32.mrf.mxu0  ;;  %v1646_v13 = vpop.f32.mrf.mxu1 }
 0x122   : > { %v2189_v14 = vadd.f32 %v4448_v51, %v1422_v12  ;;  %v2245_v15 = vadd.f32 %v4448_v51, %v1646_v13 }
 0x123   : > { %v1424_v16 = vpop.f32.mrf.mxu0  ;;  %v1648_v17 = vpop.f32.mrf.mxu1 }
 0x124   : > { %v2301_v20 = vmax.f32 %v2189_v14, 0.0  ;;  %v2357_v21 = vmax.f32 %v2245_v15, 0.0 }
 0x125   : > { %v1427_v22 = vpop.f32.mrf.mxu0  ;;  %v1651_v23 = vpop.f32.mrf.mxu1 }
 0x126   : > { %v3530_v24 = vpack.c.bf16 %v2301_v20, %v2300_v18  ;;  %v3670_v25 = vpack.c.bf16 %v2357_v21, %v2356_v19  ;;  %v2190_v28 = vadd.f32 %v4448_v51, %v1427_v22  ;;  %v2246_v29 = vadd.f32 %v4448_v51, %v1651_v23 }
 0x127   : > { %v1429_v26 = vpop.f32.mrf.mxu0  ;;  %v1653_v27 = vpop.f32.mrf.mxu1 }
 0x128   : > { %3790 = vst [vmem:[%s4465_s18 + $0x20] sm:$0xff] %v3530_v24   ;;  %3818 = vst [vmem:[%s4465_s18 + $0x100] sm:$0xff] %v3670_v25   ;;  %v2302_v36 = vmax.f32 %v2190_v28, 0.0  ;;  %v2358_v37 = vmax.f32 %v2246_v29, 0.0 }
 0x129   : > { %v1430_v30 = vpop.f32.mrf.mxu0  ;;  %v1654_v31 = vpop.f32.mrf.mxu1 }
 0x12a   : > { %v2191_v32 = vadd.f32 %v4448_v51, %v1430_v30  ;;  %v2247_v33 = vadd.f32 %v4448_v51, %v1654_v31 }
 0x12b   : > { %v1432_v34 = vpop.f32.mrf.mxu0  ;;  %v1656_v35 = vpop.f32.mrf.mxu1 }
 0x12c   : > { %v2303_v38 = vmax.f32 %v2191_v32, 0.0  ;;  %v2359_v39 = vmax.f32 %v2247_v33, 0.0 }
 0x12d   : > { %v1435_v40 = vpop.f32.mrf.mxu0  ;;  %v1659_v41 = vpop.f32.mrf.mxu1 }
 0x12e   : > { %v3535_v42 = vpack.c.bf16 %v2303_v38, %v2302_v36  ;;  %v3675_v43 = vpack.c.bf16 %v2359_v39, %v2358_v37  ;;  %v2192_v46 = vadd.f32 %v4448_v51, %v1435_v40  ;;  %v2248_v47 = vadd.f32 %v4448_v51, %v1659_v41 }
 0x12f   : > { %v1437_v44 = vpop.f32.mrf.mxu0  ;;  %v1661_v45 = vpop.f32.mrf.mxu1 }
 0x130   : > { %3791 = vst [vmem:[%s4465_s18 + $0x28] sm:$0xff] %v3535_v42   ;;  %3819 = vst [vmem:[%s4465_s18 + $0x108] sm:$0xff] %v3675_v43   ;;  %v2304_v55 = vmax.f32 %v2192_v46, 0.0  ;;  %v2360_v56 = vmax.f32 %v2248_v47, 0.0 }
 0x131   : > { %v1438_v48 = vpop.f32.mrf.mxu0  ;;  %v1662_v49 = vpop.f32.mrf.mxu1 }
 0x132   : > { %v2193_v50 = vadd.f32 %v4448_v51, %v1438_v48  ;;  %v2249_v52 = vadd.f32 %v4448_v51, %v1662_v49 }
 0x133   : > { %v1440_v53 = vpop.f32.mrf.mxu0  ;;  %v1664_v54 = vpop.f32.mrf.mxu1 }
 0x134   : > { %v2305_v57 = vmax.f32 %v2193_v50, 0.0  ;;  %v2361_v58 = vmax.f32 %v2249_v52, 0.0 }
 0x135   : > { %v1443_v59 = vpop.f32.mrf.mxu0  ;;  %v1667_v60 = vpop.f32.mrf.mxu1 }
 0x136   : > { %v3540_v61 = vpack.c.bf16 %v2305_v57, %v2304_v55  ;;  %v3680_v62 = vpack.c.bf16 %v2361_v58, %v2360_v56  ;;  %v2194_v1 = vadd.f32 %v4448_v51, %v1443_v59  ;;  %v2250_v2 = vadd.f32 %v4448_v51, %v1667_v60 }
 0x137   : > { %v1445_v63 = vpop.f32.mrf.mxu0  ;;  %v1669_v0 = vpop.f32.mrf.mxu1 }
 0x138   : > { %3792 = vst [vmem:[%s4465_s18 + $0x30] sm:$0xff] %v3540_v61   ;;  %3820 = vst [vmem:[%s4465_s18 + $0x110] sm:$0xff] %v3680_v62   ;;  %v2306_v9 = vmax.f32 %v2194_v1, 0.0  ;;  %v2362_v10 = vmax.f32 %v2250_v2, 0.0 }
 0x139   : > { %v1446_v3 = vpop.f32.mrf.mxu0  ;;  %v1670_v4 = vpop.f32.mrf.mxu1 }
 0x13a   : > { %v2195_v5 = vadd.f32 %v4448_v51, %v1446_v3  ;;  %v2251_v6 = vadd.f32 %v4448_v51, %v1670_v4 }
 0x13b   : > { %v1448_v7 = vpop.f32.mrf.mxu0  ;;  %v1672_v8 = vpop.f32.mrf.mxu1 }
 0x13c   : > { %v2307_v11 = vmax.f32 %v2195_v5, 0.0  ;;  %v2363_v12 = vmax.f32 %v2251_v6, 0.0 }
 0x13d   : > { %v1451_v13 = vpop.f32.mrf.mxu0  ;;  %v1675_v14 = vpop.f32.mrf.mxu1 }
 0x13e   : > { %v3545_v15 = vpack.c.bf16 %v2307_v11, %v2306_v9  ;;  %v3685_v16 = vpack.c.bf16 %v2363_v12, %v2362_v10  ;;  %v2196_v19 = vadd.f32 %v4448_v51, %v1451_v13  ;;  %v2252_v20 = vadd.f32 %v4448_v51, %v1675_v14 }
 0x13f   : > { %v1453_v17 = vpop.f32.mrf.mxu0  ;;  %v1677_v18 = vpop.f32.mrf.mxu1 }
 0x140   : > { %3793 = vst [vmem:[%s4465_s18 + $0x38] sm:$0xff] %v3545_v15   ;;  %3821 = vst [vmem:[%s4465_s18 + $0x118] sm:$0xff] %v3685_v16   ;;  %v2308_v27 = vmax.f32 %v2196_v19, 0.0  ;;  %v2364_v28 = vmax.f32 %v2252_v20, 0.0 }
 0x141   : > { %v1454_v21 = vpop.f32.mrf.mxu0  ;;  %v1678_v22 = vpop.f32.mrf.mxu1 }
 0x142   : > { %v2197_v23 = vadd.f32 %v4448_v51, %v1454_v21  ;;  %v2253_v24 = vadd.f32 %v4448_v51, %v1678_v22 }
 0x143   : > { %v1456_v25 = vpop.f32.mrf.mxu0  ;;  %v1680_v26 = vpop.f32.mrf.mxu1 }
 0x144   : > { %v2309_v29 = vmax.f32 %v2197_v23, 0.0  ;;  %v2365_v30 = vmax.f32 %v2253_v24, 0.0 }
 0x145   : > { %v1459_v31 = vpop.f32.mrf.mxu0  ;;  %v1683_v32 = vpop.f32.mrf.mxu1 }
 0x146   : > { %v3550_v33 = vpack.c.bf16 %v2309_v29, %v2308_v27  ;;  %v3690_v34 = vpack.c.bf16 %v2365_v30, %v2364_v28  ;;  %v2198_v37 = vadd.f32 %v4448_v51, %v1459_v31  ;;  %v2254_v38 = vadd.f32 %v4448_v51, %v1683_v32 }
 0x147   : > { %v1461_v35 = vpop.f32.mrf.mxu0  ;;  %v1685_v36 = vpop.f32.mrf.mxu1 }
 0x148   : > { %3794 = vst [vmem:[%s4465_s18 + $0x40] sm:$0xff] %v3550_v33   ;;  %3822 = vst [vmem:[%s4465_s18 + $0x120] sm:$0xff] %v3690_v34   ;;  %v2310_v45 = vmax.f32 %v2198_v37, 0.0  ;;  %v2366_v46 = vmax.f32 %v2254_v38, 0.0 }
 0x149   : > { %v1462_v39 = vpop.f32.mrf.mxu0  ;;  %v1686_v40 = vpop.f32.mrf.mxu1 }
 0x14a   : > { %v2199_v41 = vadd.f32 %v4448_v51, %v1462_v39  ;;  %v2255_v42 = vadd.f32 %v4448_v51, %v1686_v40 }
 0x14b   : > { %v1464_v43 = vpop.f32.mrf.mxu0  ;;  %v1688_v44 = vpop.f32.mrf.mxu1 }
 0x14c   : > { %v2311_v47 = vmax.f32 %v2199_v41, 0.0  ;;  %v2367_v48 = vmax.f32 %v2255_v42, 0.0 }
 0x14d   : > { %v1467_v49 = vpop.f32.mrf.mxu0  ;;  %v1691_v50 = vpop.f32.mrf.mxu1 }
 0x14e   : > { %v3555_v52 = vpack.c.bf16 %v2311_v47, %v2310_v45  ;;  %v3695_v53 = vpack.c.bf16 %v2367_v48, %v2366_v46  ;;  %v2200_v56 = vadd.f32 %v4448_v51, %v1467_v49  ;;  %v2256_v57 = vadd.f32 %v4448_v51, %v1691_v50 }
 0x14f   : > { %v1469_v54 = vpop.f32.mrf.mxu0  ;;  %v1693_v55 = vpop.f32.mrf.mxu1 }
 0x150   : > { %3795 = vst [vmem:[%s4465_s18 + $0x48] sm:$0xff] %v3555_v52   ;;  %3823 = vst [vmem:[%s4465_s18 + $0x128] sm:$0xff] %v3695_v53   ;;  %v2312_v0 = vmax.f32 %v2200_v56, 0.0  ;;  %v2368_v1 = vmax.f32 %v2256_v57, 0.0 }
 0x151   : > { %v1470_v58 = vpop.f32.mrf.mxu0  ;;  %v1694_v59 = vpop.f32.mrf.mxu1 }
 0x152   : > { %v2201_v60 = vadd.f32 %v4448_v51, %v1470_v58  ;;  %v2257_v61 = vadd.f32 %v4448_v51, %v1694_v59 }
 0x153   : > { %v1472_v62 = vpop.f32.mrf.mxu0  ;;  %v1696_v63 = vpop.f32.mrf.mxu1 }
 0x154   : > { %v2313_v2 = vmax.f32 %v2201_v60, 0.0  ;;  %v2369_v3 = vmax.f32 %v2257_v61, 0.0 }
 0x155   : > { %v1475_v4 = vpop.f32.mrf.mxu0  ;;  %v1699_v5 = vpop.f32.mrf.mxu1 }
 0x156   : > { %v3560_v6 = vpack.c.bf16 %v2313_v2, %v2312_v0  ;;  %v3700_v7 = vpack.c.bf16 %v2369_v3, %v2368_v1  ;;  %v2202_v10 = vadd.f32 %v4448_v51, %v1475_v4  ;;  %v2258_v11 = vadd.f32 %v4448_v51, %v1699_v5 }
 0x157   : > { %v1477_v8 = vpop.f32.mrf.mxu0  ;;  %v1701_v9 = vpop.f32.mrf.mxu1 }
 0x158   : > { %3796 = vst [vmem:[%s4465_s18 + $0x50] sm:$0xff] %v3560_v6   ;;  %3824 = vst [vmem:[%s4465_s18 + $0x130] sm:$0xff] %v3700_v7   ;;  %v2314_v18 = vmax.f32 %v2202_v10, 0.0  ;;  %v2370_v19 = vmax.f32 %v2258_v11, 0.0 }
 0x159   : > { %v1478_v12 = vpop.f32.mrf.mxu0  ;;  %v1702_v13 = vpop.f32.mrf.mxu1 }
 0x15a   : > { %v2203_v14 = vadd.f32 %v4448_v51, %v1478_v12  ;;  %v2259_v15 = vadd.f32 %v4448_v51, %v1702_v13 }
 0x15b   : > { %v1480_v16 = vpop.f32.mrf.mxu0  ;;  %v1704_v17 = vpop.f32.mrf.mxu1 }
 0x15c   : > { %v2315_v20 = vmax.f32 %v2203_v14, 0.0  ;;  %v2371_v21 = vmax.f32 %v2259_v15, 0.0 }
 0x15d   : > { %v1483_v22 = vpop.f32.mrf.mxu0  ;;  %v1707_v23 = vpop.f32.mrf.mxu1 }
 0x15e   : > { %v3565_v24 = vpack.c.bf16 %v2315_v20, %v2314_v18  ;;  %v3705_v25 = vpack.c.bf16 %v2371_v21, %v2370_v19  ;;  %v2204_v28 = vadd.f32 %v4448_v51, %v1483_v22  ;;  %v2260_v29 = vadd.f32 %v4448_v51, %v1707_v23 }
 0x15f   : > { %v1485_v26 = vpop.f32.mrf.mxu0  ;;  %v1709_v27 = vpop.f32.mrf.mxu1 }
 0x160   : > { %3797 = vst [vmem:[%s4465_s18 + $0x58] sm:$0xff] %v3565_v24   ;;  %3825 = vst [vmem:[%s4465_s18 + $0x138] sm:$0xff] %v3705_v25   ;;  %v2316_v36 = vmax.f32 %v2204_v28, 0.0  ;;  %v2372_v37 = vmax.f32 %v2260_v29, 0.0 }
 0x161   : > { %v1486_v30 = vpop.f32.mrf.mxu0  ;;  %v1710_v31 = vpop.f32.mrf.mxu1 }
 0x162   : > { %v2205_v32 = vadd.f32 %v4448_v51, %v1486_v30  ;;  %v2261_v33 = vadd.f32 %v4448_v51, %v1710_v31 }
 0x163   : > { %v1488_v34 = vpop.f32.mrf.mxu0  ;;  %v1712_v35 = vpop.f32.mrf.mxu1 }
 0x164   : > { %v2317_v38 = vmax.f32 %v2205_v32, 0.0  ;;  %v2373_v39 = vmax.f32 %v2261_v33, 0.0 }
 0x165   : > { %v1491_v40 = vpop.f32.mrf.mxu0  ;;  %v1715_v41 = vpop.f32.mrf.mxu1 }
 0x166   : > { %v3570_v42 = vpack.c.bf16 %v2317_v38, %v2316_v36  ;;  %v3710_v43 = vpack.c.bf16 %v2373_v39, %v2372_v37  ;;  %v2206_v46 = vadd.f32 %v4448_v51, %v1491_v40  ;;  %v2262_v47 = vadd.f32 %v4448_v51, %v1715_v41 }
 0x167   : > { %v1493_v44 = vpop.f32.mrf.mxu0  ;;  %v1717_v45 = vpop.f32.mrf.mxu1 }
 0x168   : > { %3798 = vst [vmem:[%s4465_s18 + $0x60] sm:$0xff] %v3570_v42   ;;  %3826 = vst [vmem:[%s4465_s18 + $0x140] sm:$0xff] %v3710_v43   ;;  %v2318_v55 = vmax.f32 %v2206_v46, 0.0  ;;  %v2374_v56 = vmax.f32 %v2262_v47, 0.0 }
 0x169   : > { %v1494_v48 = vpop.f32.mrf.mxu0  ;;  %v1718_v49 = vpop.f32.mrf.mxu1 }
 0x16a   : > { %v2207_v50 = vadd.f32 %v4448_v51, %v1494_v48  ;;  %v2263_v52 = vadd.f32 %v4448_v51, %v1718_v49 }
 0x16b   : > { %v1496_v53 = vpop.f32.mrf.mxu0  ;;  %v1720_v54 = vpop.f32.mrf.mxu1 }
 0x16c   : > { %v2319_v57 = vmax.f32 %v2207_v50, 0.0  ;;  %v2375_v58 = vmax.f32 %v2263_v52, 0.0 }
 0x16d   : > { %v1499_v59 = vpop.f32.mrf.mxu0  ;;  %v1723_v60 = vpop.f32.mrf.mxu1 }
 0x16e   : > { %v3575_v61 = vpack.c.bf16 %v2319_v57, %v2318_v55  ;;  %v3715_v62 = vpack.c.bf16 %v2375_v58, %v2374_v56  ;;  %v2208_v1 = vadd.f32 %v4448_v51, %v1499_v59  ;;  %v2264_v2 = vadd.f32 %v4448_v51, %v1723_v60 }
 0x16f   : > { %v1501_v63 = vpop.f32.mrf.mxu0  ;;  %v1725_v0 = vpop.f32.mrf.mxu1 }
 0x170   : > { %3799 = vst [vmem:[%s4465_s18 + $0x68] sm:$0xff] %v3575_v61   ;;  %3827 = vst [vmem:[%s4465_s18 + $0x148] sm:$0xff] %v3715_v62   ;;  %v2320_v9 = vmax.f32 %v2208_v1, 0.0  ;;  %v2376_v10 = vmax.f32 %v2264_v2, 0.0 }
 0x171   : > { %v1502_v3 = vpop.f32.mrf.mxu0  ;;  %v1726_v4 = vpop.f32.mrf.mxu1 }
 0x172   : > { %v2209_v5 = vadd.f32 %v4448_v51, %v1502_v3  ;;  %v2265_v6 = vadd.f32 %v4448_v51, %v1726_v4 }
 0x173   : > { %v1504_v7 = vpop.f32.mrf.mxu0  ;;  %v1728_v8 = vpop.f32.mrf.mxu1 }
 0x174   : > { %v2321_v11 = vmax.f32 %v2209_v5, 0.0  ;;  %v2377_v12 = vmax.f32 %v2265_v6, 0.0 }
 0x175   : > { %v1507_v13 = vpop.f32.mrf.mxu0  ;;  %v1731_v14 = vpop.f32.mrf.mxu1 }
 0x176   : > { %v3580_v15 = vpack.c.bf16 %v2321_v11, %v2320_v9  ;;  %v3720_v16 = vpack.c.bf16 %v2377_v12, %v2376_v10  ;;  %v2210_v19 = vadd.f32 %v4448_v51, %v1507_v13  ;;  %v2266_v20 = vadd.f32 %v4448_v51, %v1731_v14 }
 0x177   : > { %v1509_v17 = vpop.f32.mrf.mxu0  ;;  %v1733_v18 = vpop.f32.mrf.mxu1 }
 0x178   : > { %3800 = vst [vmem:[%s4465_s18 + $0x70] sm:$0xff] %v3580_v15   ;;  %3828 = vst [vmem:[%s4465_s18 + $0x150] sm:$0xff] %v3720_v16   ;;  %v2322_v27 = vmax.f32 %v2210_v19, 0.0  ;;  %v2378_v28 = vmax.f32 %v2266_v20, 0.0 }
 0x179   : > { %v1510_v21 = vpop.f32.mrf.mxu0  ;;  %v1734_v22 = vpop.f32.mrf.mxu1 }
 0x17a   : > { %v2211_v23 = vadd.f32 %v4448_v51, %v1510_v21  ;;  %v2267_v24 = vadd.f32 %v4448_v51, %v1734_v22 }
 0x17b   : > { %v1512_v25 = vpop.f32.mrf.mxu0  ;;  %v1736_v26 = vpop.f32.mrf.mxu1 }
 0x17c   : > { %v2323_v29 = vmax.f32 %v2211_v23, 0.0  ;;  %v2379_v30 = vmax.f32 %v2267_v24, 0.0 }
 0x17d   : > { %v1515_v31 = vpop.f32.mrf.mxu0  ;;  %v1739_v32 = vpop.f32.mrf.mxu1 }
 0x17e   : > { %v3585_v33 = vpack.c.bf16 %v2323_v29, %v2322_v27  ;;  %v3725_v34 = vpack.c.bf16 %v2379_v30, %v2378_v28  ;;  %v2212_v37 = vadd.f32 %v4448_v51, %v1515_v31  ;;  %v2268_v38 = vadd.f32 %v4448_v51, %v1739_v32 }
 0x17f   : > { %v1517_v35 = vpop.f32.mrf.mxu0  ;;  %v1741_v36 = vpop.f32.mrf.mxu1 }
 0x180   : > { %3801 = vst [vmem:[%s4465_s18 + $0x78] sm:$0xff] %v3585_v33   ;;  %3829 = vst [vmem:[%s4465_s18 + $0x158] sm:$0xff] %v3725_v34   ;;  %v2324_v45 = vmax.f32 %v2212_v37, 0.0  ;;  %v2380_v46 = vmax.f32 %v2268_v38, 0.0 }
 0x181   : > { %v1518_v39 = vpop.f32.mrf.mxu0  ;;  %v1742_v40 = vpop.f32.mrf.mxu1 }
 0x182   : > { %v2213_v41 = vadd.f32 %v4448_v51, %v1518_v39  ;;  %v2269_v42 = vadd.f32 %v4448_v51, %v1742_v40 }
 0x183   : > { %v1520_v43 = vpop.f32.mrf.mxu0  ;;  %v1744_v44 = vpop.f32.mrf.mxu1 }
 0x184   : > { %v2325_v47 = vmax.f32 %v2213_v41, 0.0  ;;  %v2381_v48 = vmax.f32 %v2269_v42, 0.0 }
 0x185   : > { %v1523_v49 = vpop.f32.mrf.mxu0  ;;  %v1747_v50 = vpop.f32.mrf.mxu1 }
 0x186   : > { %v3590_v52 = vpack.c.bf16 %v2325_v47, %v2324_v45  ;;  %v3730_v53 = vpack.c.bf16 %v2381_v48, %v2380_v46  ;;  %v2214_v56 = vadd.f32 %v4448_v51, %v1523_v49  ;;  %v2270_v57 = vadd.f32 %v4448_v51, %v1747_v50 }
 0x187   : > { %v1525_v54 = vpop.f32.mrf.mxu0  ;;  %v1749_v55 = vpop.f32.mrf.mxu1 }
 0x188   : > { %3802 = vst [vmem:[%s4465_s18 + $0x80] sm:$0xff] %v3590_v52   ;;  %3830 = vst [vmem:[%s4465_s18 + $0x160] sm:$0xff] %v3730_v53   ;;  %v2326_v0 = vmax.f32 %v2214_v56, 0.0  ;;  %v2382_v1 = vmax.f32 %v2270_v57, 0.0 }
 0x189   : > { %v1526_v58 = vpop.f32.mrf.mxu0  ;;  %v1750_v59 = vpop.f32.mrf.mxu1 }
 0x18a   : > { %v2215_v60 = vadd.f32 %v4448_v51, %v1526_v58  ;;  %v2271_v61 = vadd.f32 %v4448_v51, %v1750_v59 }
 0x18b   : > { %v1528_v62 = vpop.f32.mrf.mxu0  ;;  %v1752_v63 = vpop.f32.mrf.mxu1 }
 0x18c   : > { %v2327_v2 = vmax.f32 %v2215_v60, 0.0  ;;  %v2383_v3 = vmax.f32 %v2271_v61, 0.0 }
 0x18d   : > { %v1531_v4 = vpop.f32.mrf.mxu0  ;;  %v1755_v5 = vpop.f32.mrf.mxu1 }
 0x18e   : > { %v3595_v6 = vpack.c.bf16 %v2327_v2, %v2326_v0  ;;  %v3735_v7 = vpack.c.bf16 %v2383_v3, %v2382_v1  ;;  %v2216_v10 = vadd.f32 %v4448_v51, %v1531_v4  ;;  %v2272_v11 = vadd.f32 %v4448_v51, %v1755_v5 }
 0x18f   : > { %v1533_v8 = vpop.f32.mrf.mxu0  ;;  %v1757_v9 = vpop.f32.mrf.mxu1 }
 0x190   : > { %3803 = vst [vmem:[%s4465_s18 + $0x88] sm:$0xff] %v3595_v6   ;;  %3831 = vst [vmem:[%s4465_s18 + $0x168] sm:$0xff] %v3735_v7   ;;  %v2328_v18 = vmax.f32 %v2216_v10, 0.0  ;;  %v2384_v19 = vmax.f32 %v2272_v11, 0.0 }
 0x191   : > { %v1534_v12 = vpop.f32.mrf.mxu0  ;;  %v1758_v13 = vpop.f32.mrf.mxu1 }
 0x192   : > { %v2217_v14 = vadd.f32 %v4448_v51, %v1534_v12  ;;  %v2273_v15 = vadd.f32 %v4448_v51, %v1758_v13 }
 0x193   : > { %v1536_v16 = vpop.f32.mrf.mxu0  ;;  %v1760_v17 = vpop.f32.mrf.mxu1 }
 0x194   : > { %v2329_v20 = vmax.f32 %v2217_v14, 0.0  ;;  %v2385_v21 = vmax.f32 %v2273_v15, 0.0 }
 0x195   : > { %v1539_v22 = vpop.f32.mrf.mxu0  ;;  %v1763_v23 = vpop.f32.mrf.mxu1 }
 0x196   : > { %v3600_v24 = vpack.c.bf16 %v2329_v20, %v2328_v18  ;;  %v3740_v25 = vpack.c.bf16 %v2385_v21, %v2384_v19  ;;  %v2218_v28 = vadd.f32 %v4448_v51, %v1539_v22  ;;  %v2274_v29 = vadd.f32 %v4448_v51, %v1763_v23 }
 0x197   : > { %v1541_v26 = vpop.f32.mrf.mxu0  ;;  %v1765_v27 = vpop.f32.mrf.mxu1 }
 0x198   : > { %3804 = vst [vmem:[%s4465_s18 + $0x90] sm:$0xff] %v3600_v24   ;;  %3832 = vst [vmem:[%s4465_s18 + $0x170] sm:$0xff] %v3740_v25   ;;  %v2330_v36 = vmax.f32 %v2218_v28, 0.0  ;;  %v2386_v37 = vmax.f32 %v2274_v29, 0.0 }
 0x199   : > { %v1542_v30 = vpop.f32.mrf.mxu0  ;;  %v1766_v31 = vpop.f32.mrf.mxu1 }
 0x19a   : > { %v2219_v32 = vadd.f32 %v4448_v51, %v1542_v30  ;;  %v2275_v33 = vadd.f32 %v4448_v51, %v1766_v31 }
 0x19b   : > { %v1544_v34 = vpop.f32.mrf.mxu0  ;;  %v1768_v35 = vpop.f32.mrf.mxu1 }
 0x19c   : > { %v2331_v38 = vmax.f32 %v2219_v32, 0.0  ;;  %v2387_v39 = vmax.f32 %v2275_v33, 0.0 }
 0x19d   : > { %v1547_v40 = vpop.f32.mrf.mxu0  ;;  %v1771_v41 = vpop.f32.mrf.mxu1 }
 0x19e   : > { %v3605_v42 = vpack.c.bf16 %v2331_v38, %v2330_v36  ;;  %v3745_v43 = vpack.c.bf16 %v2387_v39, %v2386_v37  ;;  %v2220_v46 = vadd.f32 %v4448_v51, %v1547_v40  ;;  %v2276_v47 = vadd.f32 %v4448_v51, %v1771_v41 }
 0x19f   : > { %v1549_v44 = vpop.f32.mrf.mxu0  ;;  %v1773_v45 = vpop.f32.mrf.mxu1 }
 0x1a0   : > { %3805 = vst [vmem:[%s4465_s18 + $0x98] sm:$0xff] %v3605_v42   ;;  %3833 = vst [vmem:[%s4465_s18 + $0x178] sm:$0xff] %v3745_v43   ;;  %v2332_v55 = vmax.f32 %v2220_v46, 0.0  ;;  %v2388_v56 = vmax.f32 %v2276_v47, 0.0 }
 0x1a1   : > { %v1550_v48 = vpop.f32.mrf.mxu0  ;;  %v1774_v49 = vpop.f32.mrf.mxu1 }
 0x1a2   : > { %v2221_v50 = vadd.f32 %v4448_v51, %v1550_v48  ;;  %v2277_v52 = vadd.f32 %v4448_v51, %v1774_v49 }
 0x1a3   : > { %v1552_v53 = vpop.f32.mrf.mxu0  ;;  %v1776_v54 = vpop.f32.mrf.mxu1 }
 0x1a4   : > { %v2333_v57 = vmax.f32 %v2221_v50, 0.0  ;;  %v2389_v58 = vmax.f32 %v2277_v52, 0.0 }
 0x1a5   : > { %v1555_v59 = vpop.f32.mrf.mxu0  ;;  %v1779_v60 = vpop.f32.mrf.mxu1 }
 0x1a6   : > { %v3610_v61 = vpack.c.bf16 %v2333_v57, %v2332_v55  ;;  %v3750_v62 = vpack.c.bf16 %v2389_v58, %v2388_v56  ;;  %v2222_v1 = vadd.f32 %v4448_v51, %v1555_v59  ;;  %v2278_v2 = vadd.f32 %v4448_v51, %v1779_v60  ;;  %v4619_v57 = vld [vmem:[%s4702_s2] ss:$0 sm:$0xff] }
 0x1a7   : > { %v1557_v63 = vpop.f32.mrf.mxu0  ;;  %v1781_v0 = vpop.f32.mrf.mxu1 }
 0x1a8   : > { %3806 = vst [vmem:[%s4465_s18 + $0xa0] sm:$0xff] %v3610_v61   ;;  %3834 = vst [vmem:[%s4465_s18 + $0x180] sm:$0xff] %v3750_v62   ;;  %v2334_v9 = vmax.f32 %v2222_v1, 0.0  ;;  %v2390_v10 = vmax.f32 %v2278_v2, 0.0 }
 0x1a9   : > { %v1558_v3 = vpop.f32.mrf.mxu0  ;;  %v1782_v4 = vpop.f32.mrf.mxu1 }
 0x1aa   : > { %v2223_v5 = vadd.f32 %v4448_v51, %v1558_v3  ;;  %v2279_v6 = vadd.f32 %v4448_v51, %v1782_v4 }
 0x1ab   : > { %v1560_v7 = vpop.f32.mrf.mxu0  ;;  %v1784_v8 = vpop.f32.mrf.mxu1 }
 0x1ac   : > { %v2335_v11 = vmax.f32 %v2223_v5, 0.0  ;;  %v2391_v12 = vmax.f32 %v2279_v6, 0.0 }
 0x1ad   : > { %v1563_v13 = vpop.f32.mrf.mxu0  ;;  %v1787_v14 = vpop.f32.mrf.mxu1 }
 0x1ae   : > { %v3615_v15 = vpack.c.bf16 %v2335_v11, %v2334_v9  ;;  %v3755_v16 = vpack.c.bf16 %v2391_v12, %v2390_v10  ;;  %v2224_v19 = vadd.f32 %v4448_v51, %v1563_v13  ;;  %v2280_v20 = vadd.f32 %v4448_v51, %v1787_v14 }
 0x1af   : > { %v1565_v17 = vpop.f32.mrf.mxu0  ;;  %v1789_v18 = vpop.f32.mrf.mxu1 }
 0x1b0   : > { %3807 = vst [vmem:[%s4465_s18 + $0xa8] sm:$0xff] %v3615_v15   ;;  %3835 = vst [vmem:[%s4465_s18 + $0x188] sm:$0xff] %v3755_v16   ;;  %v2336_v27 = vmax.f32 %v2224_v19, 0.0  ;;  %v2392_v28 = vmax.f32 %v2280_v20, 0.0 }
 0x1b1   : > { %v1566_v21 = vpop.f32.mrf.mxu0  ;;  %v1790_v22 = vpop.f32.mrf.mxu1 }
 0x1b2   : > { %v2225_v23 = vadd.f32 %v4448_v51, %v1566_v21  ;;  %v2281_v24 = vadd.f32 %v4448_v51, %v1790_v22 }
 0x1b3   : > { %v1568_v25 = vpop.f32.mrf.mxu0  ;;  %v1792_v26 = vpop.f32.mrf.mxu1 }
 0x1b4   : > { %v2337_v29 = vmax.f32 %v2225_v23, 0.0  ;;  %v2393_v30 = vmax.f32 %v2281_v24, 0.0 }
 0x1b5   : > { %v1571_v31 = vpop.f32.mrf.mxu0  ;;  %v1795_v32 = vpop.f32.mrf.mxu1 }
 0x1b6   : > { %v3620_v33 = vpack.c.bf16 %v2337_v29, %v2336_v27  ;;  %v3760_v34 = vpack.c.bf16 %v2393_v30, %v2392_v28  ;;  %v2226_v37 = vadd.f32 %v4448_v51, %v1571_v31  ;;  %v2282_v38 = vadd.f32 %v4448_v51, %v1795_v32 }
 0x1b7   : > { %v1573_v35 = vpop.f32.mrf.mxu0  ;;  %v1797_v36 = vpop.f32.mrf.mxu1 }
 0x1b8   : > { %3808 = vst [vmem:[%s4465_s18 + $0xb0] sm:$0xff] %v3620_v33   ;;  %3836 = vst [vmem:[%s4465_s18 + $0x190] sm:$0xff] %v3760_v34   ;;  %v2338_v45 = vmax.f32 %v2226_v37, 0.0  ;;  %v2394_v46 = vmax.f32 %v2282_v38, 0.0 }
 0x1b9   : > { %v1574_v39 = vpop.f32.mrf.mxu0  ;;  %v1798_v40 = vpop.f32.mrf.mxu1 }
 0x1ba   : > { %v2227_v41 = vadd.f32 %v4448_v51, %v1574_v39  ;;  %v2283_v42 = vadd.f32 %v4448_v51, %v1798_v40 }
 0x1bb   : > { %v1576_v43 = vpop.f32.mrf.mxu0  ;;  %v1800_v44 = vpop.f32.mrf.mxu1 }
 0x1bc   : > { %v2339_v47 = vmax.f32 %v2227_v41, 0.0  ;;  %v2395_v48 = vmax.f32 %v2283_v42, 0.0 }
 0x1bd   : > { %v1579_v49 = vpop.f32.mrf.mxu0  ;;  %v1803_v50 = vpop.f32.mrf.mxu1 }
 0x1be   : > { %v3625_v52 = vpack.c.bf16 %v2339_v47, %v2338_v45  ;;  %v3765_v53 = vpack.c.bf16 %v2395_v48, %v2394_v46  ;;  %v2228_v56 = vadd.f32 %v4448_v51, %v1579_v49  ;;  %v2284_v58 = vadd.f32 %v4619_v57, %v1803_v50 }
 0x1bf   : > { %v1581_v54 = vpop.f32.mrf.mxu0  ;;  %v1805_v55 = vpop.f32.mrf.mxu1 }
 0x1c0   : > { %3809 = vst [vmem:[%s4465_s18 + $0xb8] sm:$0xff] %v3625_v52   ;;  %3837 = vst [vmem:[%s4465_s18 + $0x198] sm:$0xff] %v3765_v53   ;;  %v2340_v1 = vmax.f32 %v2228_v56, 0.0  ;;  %v2396_v2 = vmax.f32 %v2284_v58, 0.0 }
 0x1c1   : > { %v1582_v59 = vpop.f32.mrf.mxu0  ;;  %v1806_v60 = vpop.f32.mrf.mxu1 }
 0x1c2   : > { %v2229_v61 = vadd.f32 %v4619_v57, %v1582_v59  ;;  %v2285_v62 = vadd.f32 %v4619_v57, %v1806_v60 }
 0x1c3   : > { %v1584_v63 = vpop.f32.mrf.mxu0  ;;  %v1808_v0 = vpop.f32.mrf.mxu1 }
 0x1c4   : > { %v2341_v51 = vmax.f32 %v2229_v61, 0.0  ;;  %v2397_v3 = vmax.f32 %v2285_v62, 0.0 }
 0x1c5   : > { %v1587_v4 = vpop.f32.mrf.mxu0  ;;  %v1811_v5 = vpop.f32.mrf.mxu1 }
 0x1c6   : > { %v3630_v6 = vpack.c.bf16 %v2341_v51, %v2340_v1  ;;  %v3770_v7 = vpack.c.bf16 %v2397_v3, %v2396_v2  ;;  %v2230_v10 = vadd.f32 %v4619_v57, %v1587_v4  ;;  %v2286_v11 = vadd.f32 %v4619_v57, %v1811_v5 }
 0x1c7   : > { %v1589_v8 = vpop.f32.mrf.mxu0  ;;  %v1813_v9 = vpop.f32.mrf.mxu1 }
 0x1c8   : > { %3810 = vst [vmem:[%s4465_s18 + $0xc0] sm:$0xff] %v3630_v6   ;;  %3838 = vst [vmem:[%s4465_s18 + $0x1a0] sm:$0xff] %v3770_v7   ;;  %v2342_v18 = vmax.f32 %v2230_v10, 0.0  ;;  %v2398_v19 = vmax.f32 %v2286_v11, 0.0 }
 0x1c9   : > { %v1590_v12 = vpop.f32.mrf.mxu0  ;;  %v1814_v13 = vpop.f32.mrf.mxu1 }
 0x1ca   : > { %v2231_v14 = vadd.f32 %v4619_v57, %v1590_v12  ;;  %v2287_v15 = vadd.f32 %v4619_v57, %v1814_v13 }
 0x1cb   : > { %v1592_v16 = vpop.f32.mrf.mxu0  ;;  %v1816_v17 = vpop.f32.mrf.mxu1 }
 0x1cc   : > { %v2343_v20 = vmax.f32 %v2231_v14, 0.0  ;;  %v2399_v21 = vmax.f32 %v2287_v15, 0.0 }
 0x1cd   : > { %v1595_v22 = vpop.f32.mrf.mxu0  ;;  %v1819_v23 = vpop.f32.mrf.mxu1 }
 0x1ce   : > { %v3635_v24 = vpack.c.bf16 %v2343_v20, %v2342_v18  ;;  %v3775_v25 = vpack.c.bf16 %v2399_v21, %v2398_v19  ;;  %v2232_v28 = vadd.f32 %v4619_v57, %v1595_v22  ;;  %v2288_v29 = vadd.f32 %v4619_v57, %v1819_v23 }
 0x1cf   : > { %v1597_v26 = vpop.f32.mrf.mxu0  ;;  %v1821_v27 = vpop.f32.mrf.mxu1 }
 0x1d0   : > { %3811 = vst [vmem:[%s4465_s18 + $0xc8] sm:$0xff] %v3635_v24   ;;  %3839 = vst [vmem:[%s4465_s18 + $0x1a8] sm:$0xff] %v3775_v25   ;;  %v2344_v36 = vmax.f32 %v2232_v28, 0.0  ;;  %v2400_v37 = vmax.f32 %v2288_v29, 0.0 }
 0x1d1   : > { %v1598_v30 = vpop.f32.mrf.mxu0  ;;  %v1822_v31 = vpop.f32.mrf.mxu1 }
 0x1d2   : > { %v2233_v32 = vadd.f32 %v4619_v57, %v1598_v30  ;;  %v2289_v33 = vadd.f32 %v4619_v57, %v1822_v31 }
 0x1d3   : > { %v1600_v34 = vpop.f32.mrf.mxu0  ;;  %v1824_v35 = vpop.f32.mrf.mxu1 }
 0x1d4   : > { %v2345_v38 = vmax.f32 %v2233_v32, 0.0  ;;  %v2401_v39 = vmax.f32 %v2289_v33, 0.0 }
 0x1d5   : > { %v1603_v40 = vpop.f32.mrf.mxu0  ;;  %v1827_v41 = vpop.f32.mrf.mxu1 }
 0x1d6   : > { %v3640_v42 = vpack.c.bf16 %v2345_v38, %v2344_v36  ;;  %v3780_v43 = vpack.c.bf16 %v2401_v39, %v2400_v37  ;;  %v2234_v46 = vadd.f32 %v4619_v57, %v1603_v40  ;;  %v2290_v47 = vadd.f32 %v4619_v57, %v1827_v41 }
 0x1d7   : > { %v1605_v44 = vpop.f32.mrf.mxu0  ;;  %v1829_v45 = vpop.f32.mrf.mxu1 }
 0x1d8   : > { %3812 = vst [vmem:[%s4465_s18 + $0xd0] sm:$0xff] %v3640_v42   ;;  %3840 = vst [vmem:[%s4465_s18 + $0x1b0] sm:$0xff] %v3780_v43   ;;  %v2346_v55 = vmax.f32 %v2234_v46, 0.0  ;;  %v2402_v56 = vmax.f32 %v2290_v47, 0.0 }
 0x1d9   : > { %v1606_v48 = vpop.f32.mrf.mxu0  ;;  %v1830_v49 = vpop.f32.mrf.mxu1 }
 0x1da   : > { %v2235_v50 = vadd.f32 %v4619_v57, %v1606_v48  ;;  %v2291_v52 = vadd.f32 %v4619_v57, %v1830_v49 }
 0x1db   : > { %v1608_v53 = vpop.f32.mrf.mxu0  ;;  %v1832_v54 = vpop.f32.mrf.mxu1 }
 0x1dc   : > { %v2347_v58 = vmax.f32 %v2235_v50, 0.0  ;;  %v2403_v59 = vmax.f32 %v2291_v52, 0.0 }
 0x1de   : > { %v3645_v60 = vpack.c.bf16 %v2347_v58, %v2346_v55  ;;  %v3785_v57 = vpack.c.bf16 %v2403_v59, %v2402_v56 }
 0x1e0   : > { %3813 = vst [vmem:[%s4465_s18 + $0xd8] sm:$0xff] %v3645_v60   ;;  %3841 = vst [vmem:[%s4465_s18 + $0x1b8] sm:$0xff] %v3785_v57  }
 0x1e1   : > { %4113 = shalt.err (!%p4110_p5)
}
 0x1e2   : > { %s4114_s6 = scalar_lea.hbm %s4647_s28, 7168  ;;  %s4118_s9 = scalar_lea.hbm %s4703_s3, 200704 }
 0x1e3   : > { %p4115_p6 = scmp.ne.s32.totalorder %s4647_s28, %s4114_s6  ;;  %p4119_p10 = scmp.lt.s32.totalorder %s4647_s28, %s4703_s3 }
 0x1e4   : > { %p4120_p11 = scmp.lt.s32.totalorder %s4118_s9, %s4114_s6 }
 0x1e5   : > { %p4116_p7 = pnand %p4115_p6, %p4242_p4 }
 0x1e6   : > { %p4121_p12 = por %p4120_p11, %p4119_p10 }
 0x1e7   : > { %p4117_p9 = pneg %p4116_p7 }
 0x1e9   : > { %p4122_p13 = pnand %p4121_p12, %p4117_p9 }
 0x1eb   : > { %4125 = shalt.err (!%p4122_p13)
}
 0x1ec   : > { %s4180_s11 = smov 64   ;;  %s4181_s19 = smov 4  }
 0x1ed   : > { %3863 = dma.vmem_to_hbm [thread:$0]  (%p4242_p4), %s4649_s23, 7168, %s4647_s28, %s4655_s15, %s4180_s11, %s4180_s11, %s4181_s19  }
 0x1ee PF: > { %p3869_p0 = scmp.ge.s32.totalorder %s4176_s17, 2  ;;  %s2994_s21 = sand.u32 1, %s4156_s12  }
 0x1ef   : > { %s2995_s26 = scalar_lea.sflag [#allocation4], %s2994_s21 }
 0x1f0   : > { %p3866_p1 = pnand %p3869_p0, %p4249_p8 }
 0x1f2   : > { %p3867_p2 = pneg %p3866_p1 }
 0x1f4   : > { %4151 = dma.done.wait (%p3867_p2), %s2995_s26, 7168  }
 0x1f5   : > { %4153 = vsyncadd (%p3867_p2), %s2995_s26, 4294960128  ;;  %s16_s17 = sadd.s32 1, %s4176_s17   ;;  %s4706_s12 = smov %s4160_s13 }
 0x1f6   : > { %p13_p3 = scmp.ge.s32.totalorder %s16_s17, 30   ;;  %s4707_s13 = smov %s4164_s14 }
 0x1f7   : > { %s4708_s14 = smov %s4255_s25  ;;  %s4709_s15 = smov %s4172_s16 }
 0x1f8   : > { %s4710_s16 = smov %s4712_s20  ;;  %15 = sbr.rel (!%p13_p3) target bundleno = 4 (0x4), region = 81 }
 0x1fd   :  { %3000 = vsyncpa [#allocation4], 1 }
 0x1fe   :  { %3002 = vsyncpa [#allocation4 + $0x1], 1 }

</bundles_post_ra>
